<compile_context>
chip_gen: v7x
topology: tpu7x:2x2x1
jax: 0.10.0
libtpu: 0.0.40
codegen_flags: <defaults>
</compile_context>

<pallas_src>
import functools

import jax
import jax.numpy as jnp
from jax.experimental import pallas as pl
from jax.experimental.pallas import tpu as pltpu

N_EMBED = 64
N_HEADS = 8
HEAD_SIZE = N_EMBED // N_HEADS
N_INNER = 4 * N_EMBED
LN_EPS = 1e-5
MM_DTYPE = jnp.bfloat16          # matmul-input dtype for the MXU


def _layernorm(x, gamma, beta):
    mu = jnp.mean(x, axis=-1, keepdims=True)
    var = jnp.mean((x - mu) ** 2, axis=-1, keepdims=True)
    return (x - mu) * jax.lax.rsqrt(var + LN_EPS) * gamma + beta


def block_kernel(x_ref,
                 g1_ref, b1_ref,
                 wqkv_ref,
                 wp_ref, bp_ref,
                 w1_ref, bf1_ref, w2_ref, bf2_ref,
                 g2_ref, b2_ref,
                 o_ref, *, bb, seq):
    M, C = x_ref.shape                       # M = bb * seq (flattened rows)
    H, D = N_HEADS, HEAD_SIZE
    x2d = x_ref[...].astype(jnp.float32)

    # ---- x = x + SA(LN1(x)) -------------------------------------------------
    xn = _layernorm(x2d, g1_ref[0], b1_ref[0])

    # Fused QKV: one (M, 3C) matmul. Weights are bf16; the 1/sqrt(n_embed)
    # score scale is already folded into the Q columns host-side.
    qkv = jnp.dot(xn.astype(MM_DTYPE), wqkv_ref[...],
                  preferred_element_type=jnp.float32)

    def to_heads(z):                         # (M, C) -> (bb*H, seq, D)
        z = z.reshape(bb, seq, H, D)
        z = jnp.transpose(z, (0, 2, 1, 3))   # (bb, H, seq, D)
        return z.reshape(bb * H, seq, D)

    q = to_heads(qkv[:, :C]).astype(MM_DTYPE)
    k = to_heads(qkv[:, C:2 * C]).astype(MM_DTYPE)
    v = to_heads(qkv[:, 2 * C:]).astype(MM_DTYPE)

    # Causal mask shared by all (batch, head) pairs.
    row = jax.lax.broadcasted_iota(jnp.int32, (seq, seq), 0)
    col = jax.lax.broadcasted_iota(jnp.int32, (seq, seq), 1)
    causal = (col <= row)[None, :, :]

    # All heads in one batched einsum (single batch dim = bb*H).
    s = jnp.einsum('btd,bsd->bts', q, k, preferred_element_type=jnp.float32)
    s = jnp.where(causal, s, -1e30)          # finite "-inf" (Python literal)
    s = s - jnp.max(s, axis=-1, keepdims=True)
    p = jnp.exp(s)
    p = p * pl.reciprocal(jnp.sum(p, axis=-1, keepdims=True), approx=True)

    att = jnp.einsum('bts,bsd->btd', p.astype(MM_DTYPE), v,
                     preferred_element_type=jnp.float32)
    # Merge heads straight back into the (M, C) slab (no concatenate).
    att = jnp.transpose(att.reshape(bb, H, seq, D), (0, 2, 1, 3)).reshape(M, C)

    att = jnp.dot(att.astype(MM_DTYPE), wp_ref[...],
                  preferred_element_type=jnp.float32) + bp_ref[0]
    x1 = x2d + att

    # ---- x = x + FFN(LN2(x)) ------------------------------------------------
    xn2 = _layernorm(x1, g2_ref[0], b2_ref[0])
    hdn = jnp.dot(xn2.astype(MM_DTYPE), w1_ref[...],
                  preferred_element_type=jnp.float32) + bf1_ref[0]
    hdn = jnp.maximum(hdn, 0.0)
    y = jnp.dot(hdn.astype(MM_DTYPE), w2_ref[...],
                preferred_element_type=jnp.float32) + bf2_ref[0]

    o_ref[...] = (x1 + y).astype(o_ref.dtype)


def _pick_b_blk(B, T, target_rows=512):
    """Batch elements per grid step.

    Aim for >= target_rows rows per step (MXU-friendly M) while keeping the
    grid >= 2 steps when B allows (v7x has 2 TensorCores).  The flattened
    (b_blk*T, C) block must satisfy sublane tiling (b_blk*T % 8 == 0) unless it
    covers the whole batch.
    """
    divs = [d for d in range(1, B + 1) if B % d == 0]
    valid = [d for d in divs if (d * T) % 8 == 0 or d == B]
    for d in valid:                                   # enough rows AND >=2 steps
        if d * T >= target_rows and B // d >= 2:
            return d
    for d in valid:                                   # enough rows, single step
        if d * T >= target_rows:
            return d
    two_step = [d for d in valid if B // d >= 2]      # small shapes: keep 2 steps
    return two_step[-1] if two_step else valid[-1]


def _vmem_limit_bytes(bb, T):
    """Rough per-step footprint -> explicit scoped-VMEM limit (v5e default is 16 MiB)."""
    m = bb * T
    io = 2 * 2 * m * N_EMBED * 4                                    # dbl-buffered x/out (f32)
    weights = 2 * 2 * (3 * N_EMBED * N_EMBED + N_EMBED * N_EMBED
                       + 2 * N_EMBED * N_INNER)                     # bf16, dbl-buffered
    acts = 4 * m * (3 * N_EMBED          # qkv
                    + 3 * N_EMBED        # q/k/v head views
                    + 2 * N_HEADS * T    # scores + probs
                    + 2 * N_EMBED        # attention out + proj
                    + N_INNER            # ffn hidden
                    + 4 * N_EMBED)       # LN / residual temporaries
    est = io + weights + acts + (2 << 20)
    # Cap at 64 MiB so the same setting is safe on v7x (64 MiB physical VMEM).
    return int(min(max(2 * est, 32 << 20), 64 << 20))


def transformer_block(x, params, b_blk=None):
    B, T, C = x.shape
    assert C == N_EMBED
    if b_blk is None:
        b_blk = _pick_b_blk(B, T)
    assert B % b_blk == 0
    m_blk = b_blk * T
    assert m_blk % 8 == 0 or b_blk == B

    # Host-side weight prep: fold 1/sqrt(n_embed) into Wq, fuse QKV, cast bf16.
    inv_scale = 1.0 / (C ** 0.5)             # reference scales by sqrt(n_embed), not head_size
    wqkv = jnp.concatenate(
        [params["wq"] * inv_scale, params["wk"], params["wv"]], axis=1
    ).astype(MM_DTYPE)
    wp = params["wp"].astype(MM_DTYPE)
    w1 = params["w1"].astype(MM_DTYPE)
    w2 = params["w2"].astype(MM_DTYPE)

    x2 = x.reshape(B * T, C)                  # flatten: dense matmuls see M = b_blk*T rows

    full = lambda shape: pl.BlockSpec(shape, lambda i, _n=len(shape): (0,) * _n)
    in_specs = [
        pl.BlockSpec((m_blk, C), lambda i: (i, 0)),      # x (flattened rows)
        full((1, C)), full((1, C)),                      # ln1 gamma, beta (f32)
        full((C, 3 * C)),                                # fused Wqkv (bf16, scale folded)
        full((C, C)), full((1, C)),                      # Wproj (bf16), bproj (f32)
        full((C, N_INNER)), full((1, N_INNER)),          # W1 (bf16), b1 (f32)
        full((N_INNER, C)), full((1, C)),                # W2 (bf16), b2 (f32)
        full((1, C)), full((1, C)),                      # ln2 gamma, beta (f32)
    ]

    kernel = functools.partial(block_kernel, bb=b_blk, seq=T)

    out2 = pl.pallas_call(
        kernel,
        out_shape=jax.ShapeDtypeStruct((B * T, C), x.dtype),
        grid_spec=pltpu.PrefetchScalarGridSpec(
            num_scalar_prefetch=0,
            grid=(B // b_blk,),
            in_specs=in_specs,
            out_specs=pl.BlockSpec((m_blk, C), lambda i: (i, 0)),
        ),
        compiler_params=pltpu.CompilerParams(
            dimension_semantics=("parallel",),
            vmem_limit_bytes=_vmem_limit_bytes(b_blk, T)),
    )(x2,
      params["g1"], params["b1"],
      wqkv,
      wp, params["bp"],
      w1, params["bf1"], w2, params["bf2"],
      params["g2"], params["b2"])
    return out2.reshape(B, T, C)


def init_params(key):
    ks = jax.random.split(key, 12)
    n = lambda k, shape, s=0.02: (s * jax.random.normal(k, shape)).astype(jnp.float32)
    return {
        "g1": 1.0 + n(ks[0], (1, N_EMBED)),
        "b1": n(ks[1], (1, N_EMBED)),
        "wq": n(ks[2], (N_EMBED, N_EMBED)),
        "wk": n(ks[3], (N_EMBED, N_EMBED)),
        "wv": n(ks[4], (N_EMBED, N_EMBED)),
        "wp": n(ks[5], (N_EMBED, N_EMBED)),
        "bp": n(ks[6], (1, N_EMBED)),
        "w1": n(ks[7], (N_EMBED, N_INNER)),
        "bf1": n(ks[8], (1, N_INNER)),
        "w2": n(ks[9], (N_INNER, N_EMBED)),
        "bf2": n(ks[10], (1, N_EMBED)),
        "g2": 1.0 + n(ks[11], (1, N_EMBED)),
        "b2": jnp.zeros((1, N_EMBED), jnp.float32),
    }


if __name__ == "__main__":
    key = jax.random.PRNGKey(0)
    k_x, k_p = jax.random.split(key)

    B, T = 2, 8                      # T <= context_len (256)
    x = jax.random.normal(k_x, (B, T, N_EMBED), dtype=jnp.float32)
    params = init_params(k_p)

    out = transformer_block(x, params)
    jax.block_until_ready(out)
    assert out.shape == (B, T, N_EMBED) and out.dtype == x.dtype
    assert bool(jnp.all(jnp.isfinite(out)))
    print("KERNEL_OK")
</pallas_src>

<mosaic_0001>
module attributes {stable_mosaic.version = 11 : i64} {
  func.func @block_kernel(%arg0: i32, %arg1: memref<8x64xf32, #tpu.memory_space<vmem>>, %arg2: memref<1x64xf32, #tpu.memory_space<vmem>>, %arg3: memref<1x64xf32, #tpu.memory_space<vmem>>, %arg4: memref<64x192xbf16, #tpu.memory_space<vmem>>, %arg5: memref<64x64xbf16, #tpu.memory_space<vmem>>, %arg6: memref<1x64xf32, #tpu.memory_space<vmem>>, %arg7: memref<64x256xbf16, #tpu.memory_space<vmem>>, %arg8: memref<1x256xf32, #tpu.memory_space<vmem>>, %arg9: memref<256x64xbf16, #tpu.memory_space<vmem>>, %arg10: memref<1x64xf32, #tpu.memory_space<vmem>>, %arg11: memref<1x64xf32, #tpu.memory_space<vmem>>, %arg12: memref<1x64xf32, #tpu.memory_space<vmem>>, %arg13: memref<8x64xf32, #tpu.memory_space<vmem>>) attributes {dimension_semantics = [#tpu.dimension_semantics<parallel>], iteration_bounds = array<i64: 2>, scalar_prefetch = 0 : i64, scratch_operands = 0 : i64, tpu.core_type = #tpu.core_type<tc>, window_params = [{transform_indices = @transform_0, window_bounds = array<i64: 8, 64>}, {pipeline_mode = #tpu.pipeline_mode<synchronous>, transform_indices = @transform_1, window_bounds = array<i64: 1, 64>}, {pipeline_mode = #tpu.pipeline_mode<synchronous>, transform_indices = @transform_2, window_bounds = array<i64: 1, 64>}, {pipeline_mode = #tpu.pipeline_mode<synchronous>, transform_indices = @transform_3, window_bounds = array<i64: 64, 192>}, {pipeline_mode = #tpu.pipeline_mode<synchronous>, transform_indices = @transform_4, window_bounds = array<i64: 64, 64>}, {pipeline_mode = #tpu.pipeline_mode<synchronous>, transform_indices = @transform_5, window_bounds = array<i64: 1, 64>}, {pipeline_mode = #tpu.pipeline_mode<synchronous>, transform_indices = @transform_6, window_bounds = array<i64: 64, 256>}, {pipeline_mode = #tpu.pipeline_mode<synchronous>, transform_indices = @transform_7, window_bounds = array<i64: 1, 256>}, {pipeline_mode = #tpu.pipeline_mode<synchronous>, transform_indices = @transform_8, window_bounds = array<i64: 256, 64>}, {pipeline_mode = #tpu.pipeline_mode<synchronous>, transform_indices = @transform_9, window_bounds = array<i64: 1, 64>}, {pipeline_mode = #tpu.pipeline_mode<synchronous>, transform_indices = @transform_10, window_bounds = array<i64: 1, 64>}, {pipeline_mode = #tpu.pipeline_mode<synchronous>, transform_indices = @transform_11, window_bounds = array<i64: 1, 64>}, {transform_indices = @transform_12, window_bounds = array<i64: 8, 64>}]} {
    %c0 = arith.constant 0 : index
    %c0_0 = arith.constant 0 : index
    %0 = vector.load %arg1[%c0, %c0_0] : memref<8x64xf32, #tpu.memory_space<vmem>>, vector<8x64xf32>
    %c0_1 = arith.constant 0 : index
    %c0_2 = arith.constant 0 : index
    %1 = vector.load %arg2[%c0_1, %c0_2] : memref<1x64xf32, #tpu.memory_space<vmem>>, vector<1x64xf32>
    %2 = vector.shape_cast %1 : vector<1x64xf32> to vector<64xf32>
    %c0_3 = arith.constant 0 : index
    %c0_4 = arith.constant 0 : index
    %3 = vector.load %arg3[%c0_3, %c0_4] : memref<1x64xf32, #tpu.memory_space<vmem>>, vector<1x64xf32>
    %4 = vector.shape_cast %3 : vector<1x64xf32> to vector<64xf32>
    %cst = arith.constant dense<0.000000e+00> : vector<8xf32>
    %5 = vector.multi_reduction <add>, %0, %cst [1] : vector<8x64xf32> to vector<8xf32>
    %6 = vector.shape_cast %5 : vector<8xf32> to vector<8x1xf32>
    %cst_5 = arith.constant 6.400000e+01 : f32
    %7 = vector.broadcast %cst_5 : f32 to vector<8x1xf32>
    %8 = arith.divf %6, %7 : vector<8x1xf32>
    %9 = vector.broadcast %8 : vector<8x1xf32> to vector<8x64xf32>
    %10 = arith.subf %0, %9 : vector<8x64xf32>
    %11 = arith.mulf %10, %10 : vector<8x64xf32>
    %cst_6 = arith.constant dense<0.000000e+00> : vector<8xf32>
    %12 = vector.multi_reduction <add>, %11, %cst_6 [1] : vector<8x64xf32> to vector<8xf32>
    %13 = vector.shape_cast %12 : vector<8xf32> to vector<8x1xf32>
    %cst_7 = arith.constant 6.400000e+01 : f32
    %14 = vector.broadcast %cst_7 : f32 to vector<8x1xf32>
    %15 = arith.divf %13, %14 : vector<8x1xf32>
    %16 = vector.broadcast %8 : vector<8x1xf32> to vector<8x64xf32>
    %17 = arith.subf %0, %16 : vector<8x64xf32>
    %cst_8 = arith.constant 9.99999974E-6 : f32
    %18 = vector.broadcast %cst_8 : f32 to vector<8x1xf32>
    %19 = arith.addf %15, %18 : vector<8x1xf32>
    %20 = math.rsqrt %19 : vector<8x1xf32>
    %21 = vector.broadcast %20 : vector<8x1xf32> to vector<8x64xf32>
    %22 = arith.mulf %17, %21 : vector<8x64xf32>
    %23 = vector.shape_cast %2 : vector<64xf32> to vector<1x64xf32>
    %24 = vector.broadcast %23 : vector<1x64xf32> to vector<8x64xf32>
    %25 = arith.mulf %22, %24 : vector<8x64xf32>
    %26 = vector.shape_cast %4 : vector<64xf32> to vector<1x64xf32>
    %27 = vector.broadcast %26 : vector<1x64xf32> to vector<8x64xf32>
    %28 = arith.addf %25, %27 : vector<8x64xf32>
    %29 = arith.truncf %28 : vector<8x64xf32> to vector<8x64xbf16>
    %c0_9 = arith.constant 0 : index
    %c0_10 = arith.constant 0 : index
    %30 = vector.load %arg4[%c0_9, %c0_10] : memref<64x192xbf16, #tpu.memory_space<vmem>>, vector<64x192xbf16>
    %cst_11 = arith.constant dense<0.000000e+00> : vector<8x192xf32>
    %31 = tpu.matmul %29, %30, %cst_11 {dimension_numbers = #tpu.dot_dimension_numbers<[1], [0], [0], [1], [0, 0, 1, 1], [], []>} : vector<8x64xbf16>, vector<64x192xbf16>, vector<8x192xf32> -> vector<8x192xf32>
    %32 = vector.extract_strided_slice %31 {offsets = [0, 0], sizes = [8, 64], strides = [1, 1]} : vector<8x192xf32> to vector<8x64xf32>
    %33 = vector.shape_cast %32 : vector<8x64xf32> to vector<1x8x8x8xf32>
    %34 = tpu.transpose %33, [0, 2, 1, 3] : vector<1x8x8x8xf32> -> vector<1x8x8x8xf32>
    %35 = vector.shape_cast %34 : vector<1x8x8x8xf32> to vector<8x8x8xf32>
    %36 = arith.truncf %35 : vector<8x8x8xf32> to vector<8x8x8xbf16>
    %37 = vector.extract_strided_slice %31 {offsets = [0, 64], sizes = [8, 64], strides = [1, 1]} : vector<8x192xf32> to vector<8x64xf32>
    %38 = vector.shape_cast %37 : vector<8x64xf32> to vector<1x8x8x8xf32>
    %39 = tpu.transpose %38, [0, 2, 1, 3] : vector<1x8x8x8xf32> -> vector<1x8x8x8xf32>
    %40 = vector.shape_cast %39 : vector<1x8x8x8xf32> to vector<8x8x8xf32>
    %41 = arith.truncf %40 : vector<8x8x8xf32> to vector<8x8x8xbf16>
    %42 = vector.extract_strided_slice %31 {offsets = [0, 128], sizes = [8, 64], strides = [1, 1]} : vector<8x192xf32> to vector<8x64xf32>
    %43 = vector.shape_cast %42 : vector<8x64xf32> to vector<1x8x8x8xf32>
    %44 = tpu.transpose %43, [0, 2, 1, 3] : vector<1x8x8x8xf32> -> vector<1x8x8x8xf32>
    %45 = vector.shape_cast %44 : vector<1x8x8x8xf32> to vector<8x8x8xf32>
    %46 = arith.truncf %45 : vector<8x8x8xf32> to vector<8x8x8xbf16>
    %47 = tpu.iota {dimensions = array<i32: 0>} : vector<8x8xi32>
    %48 = tpu.iota {dimensions = array<i32: 1>} : vector<8x8xi32>
    %49 = arith.cmpi sle, %48, %47 : vector<8x8xi32>
    %50 = vector.shape_cast %49 : vector<8x8xi1> to vector<1x8x8xi1>
    "tpu.trace_start"() <{level = 10 : i32, message = "btd,bsd->bts"}> : () -> ()
    %cst_12 = arith.constant dense<0.000000e+00> : vector<8x8x8xf32>
    %51 = tpu.matmul %36, %41, %cst_12 {dimension_numbers = #tpu.dot_dimension_numbers<[2], [2], [1], [1], [0, 0, 0, 1, 1, 1], [0], [0]>} : vector<8x8x8xbf16>, vector<8x8x8xbf16>, vector<8x8x8xf32> -> vector<8x8x8xf32>
    %cst_13 = arith.constant -1.000000e+30 : f32
    "tpu.trace_stop"() : () -> ()
    %52 = vector.shape_cast %50 : vector<1x8x8xi1> to vector<1x8x8xi1>
    %53 = vector.broadcast %52 : vector<1x8x8xi1> to vector<8x8x8xi1>
    %54 = vector.broadcast %cst_13 : f32 to vector<8x8x8xf32>
    %55 = arith.select %53, %51, %54 : vector<8x8x8xi1>, vector<8x8x8xf32>
    %cst_14 = arith.constant dense<0xFF800000> : vector<8x8xf32>
    %56 = vector.multi_reduction <maximumf>, %55, %cst_14 [2] : vector<8x8x8xf32> to vector<8x8xf32>
    %57 = vector.shape_cast %56 : vector<8x8xf32> to vector<8x8x1xf32>
    %58 = vector.broadcast %57 : vector<8x8x1xf32> to vector<8x8x8xf32>
    %59 = arith.subf %55, %58 : vector<8x8x8xf32>
    %60 = math.exp %59 : vector<8x8x8xf32>
    %cst_15 = arith.constant dense<0.000000e+00> : vector<8x8xf32>
    %61 = vector.multi_reduction <add>, %60, %cst_15 [2] : vector<8x8x8xf32> to vector<8x8xf32>
    %62 = vector.shape_cast %61 : vector<8x8xf32> to vector<8x8x1xf32>
    %63 = tpu.reciprocal %62 {approx = true} : vector<8x8x1xf32> -> vector<8x8x1xf32>
    %64 = vector.broadcast %63 : vector<8x8x1xf32> to vector<8x8x8xf32>
    %65 = arith.mulf %60, %64 : vector<8x8x8xf32>
    %66 = arith.truncf %65 : vector<8x8x8xf32> to vector<8x8x8xbf16>
    "tpu.trace_start"() <{level = 10 : i32, message = "bts,bsd->btd"}> : () -> ()
    %cst_16 = arith.constant dense<0.000000e+00> : vector<8x8x8xf32>
    %67 = tpu.matmul %66, %46, %cst_16 {dimension_numbers = #tpu.dot_dimension_numbers<[2], [1], [1], [2], [0, 0, 0, 1, 1, 2], [0], [0]>} : vector<8x8x8xbf16>, vector<8x8x8xbf16>, vector<8x8x8xf32> -> vector<8x8x8xf32>
    "tpu.trace_stop"() : () -> ()
    %68 = vector.shape_cast %67 : vector<8x8x8xf32> to vector<1x8x8x8xf32>
    %69 = tpu.transpose %68, [0, 2, 1, 3] : vector<1x8x8x8xf32> -> vector<1x8x8x8xf32>
    %70 = vector.shape_cast %69 : vector<1x8x8x8xf32> to vector<8x64xf32>
    %71 = arith.truncf %70 : vector<8x64xf32> to vector<8x64xbf16>
    %c0_17 = arith.constant 0 : index
    %c0_18 = arith.constant 0 : index
    %72 = vector.load %arg5[%c0_17, %c0_18] : memref<64x64xbf16, #tpu.memory_space<vmem>>, vector<64x64xbf16>
    %cst_19 = arith.constant dense<0.000000e+00> : vector<8x64xf32>
    %73 = tpu.matmul %71, %72, %cst_19 {dimension_numbers = #tpu.dot_dimension_numbers<[1], [0], [0], [1], [0, 0, 1, 1], [], []>} : vector<8x64xbf16>, vector<64x64xbf16>, vector<8x64xf32> -> vector<8x64xf32>
    %c0_20 = arith.constant 0 : index
    %c0_21 = arith.constant 0 : index
    %74 = vector.load %arg6[%c0_20, %c0_21] : memref<1x64xf32, #tpu.memory_space<vmem>>, vector<1x64xf32>
    %75 = vector.shape_cast %74 : vector<1x64xf32> to vector<64xf32>
    %76 = vector.shape_cast %75 : vector<64xf32> to vector<1x64xf32>
    %77 = vector.broadcast %76 : vector<1x64xf32> to vector<8x64xf32>
    %78 = arith.addf %73, %77 : vector<8x64xf32>
    %79 = arith.addf %0, %78 : vector<8x64xf32>
    %c0_22 = arith.constant 0 : index
    %c0_23 = arith.constant 0 : index
    %80 = vector.load %arg11[%c0_22, %c0_23] : memref<1x64xf32, #tpu.memory_space<vmem>>, vector<1x64xf32>
    %81 = vector.shape_cast %80 : vector<1x64xf32> to vector<64xf32>
    %c0_24 = arith.constant 0 : index
    %c0_25 = arith.constant 0 : index
    %82 = vector.load %arg12[%c0_24, %c0_25] : memref<1x64xf32, #tpu.memory_space<vmem>>, vector<1x64xf32>
    %83 = vector.shape_cast %82 : vector<1x64xf32> to vector<64xf32>
    %cst_26 = arith.constant dense<0.000000e+00> : vector<8xf32>
    %84 = vector.multi_reduction <add>, %79, %cst_26 [1] : vector<8x64xf32> to vector<8xf32>
    %85 = vector.shape_cast %84 : vector<8xf32> to vector<8x1xf32>
    %cst_27 = arith.constant 6.400000e+01 : f32
    %86 = vector.broadcast %cst_27 : f32 to vector<8x1xf32>
    %87 = arith.divf %85, %86 : vector<8x1xf32>
    %88 = vector.broadcast %87 : vector<8x1xf32> to vector<8x64xf32>
    %89 = arith.subf %79, %88 : vector<8x64xf32>
    %90 = arith.mulf %89, %89 : vector<8x64xf32>
    %cst_28 = arith.constant dense<0.000000e+00> : vector<8xf32>
    %91 = vector.multi_reduction <add>, %90, %cst_28 [1] : vector<8x64xf32> to vector<8xf32>
    %92 = vector.shape_cast %91 : vector<8xf32> to vector<8x1xf32>
    %cst_29 = arith.constant 6.400000e+01 : f32
    %93 = vector.broadcast %cst_29 : f32 to vector<8x1xf32>
    %94 = arith.divf %92, %93 : vector<8x1xf32>
    %95 = vector.broadcast %87 : vector<8x1xf32> to vector<8x64xf32>
    %96 = arith.subf %79, %95 : vector<8x64xf32>
    %cst_30 = arith.constant 9.99999974E-6 : f32
    %97 = vector.broadcast %cst_30 : f32 to vector<8x1xf32>
    %98 = arith.addf %94, %97 : vector<8x1xf32>
    %99 = math.rsqrt %98 : vector<8x1xf32>
    %100 = vector.broadcast %99 : vector<8x1xf32> to vector<8x64xf32>
    %101 = arith.mulf %96, %100 : vector<8x64xf32>
    %102 = vector.shape_cast %81 : vector<64xf32> to vector<1x64xf32>
    %103 = vector.broadcast %102 : vector<1x64xf32> to vector<8x64xf32>
    %104 = arith.mulf %101, %103 : vector<8x64xf32>
    %105 = vector.shape_cast %83 : vector<64xf32> to vector<1x64xf32>
    %106 = vector.broadcast %105 : vector<1x64xf32> to vector<8x64xf32>
    %107 = arith.addf %104, %106 : vector<8x64xf32>
    %108 = arith.truncf %107 : vector<8x64xf32> to vector<8x64xbf16>
    %c0_31 = arith.constant 0 : index
    %c0_32 = arith.constant 0 : index
    %109 = vector.load %arg7[%c0_31, %c0_32] : memref<64x256xbf16, #tpu.memory_space<vmem>>, vector<64x256xbf16>
    %cst_33 = arith.constant dense<0.000000e+00> : vector<8x256xf32>
    %110 = tpu.matmul %108, %109, %cst_33 {dimension_numbers = #tpu.dot_dimension_numbers<[1], [0], [0], [1], [0, 0, 1, 1], [], []>} : vector<8x64xbf16>, vector<64x256xbf16>, vector<8x256xf32> -> vector<8x256xf32>
    %c0_34 = arith.constant 0 : index
    %c0_35 = arith.constant 0 : index
    %111 = vector.load %arg8[%c0_34, %c0_35] : memref<1x256xf32, #tpu.memory_space<vmem>>, vector<1x256xf32>
    %112 = vector.shape_cast %111 : vector<1x256xf32> to vector<256xf32>
    %113 = vector.shape_cast %112 : vector<256xf32> to vector<1x256xf32>
    %114 = vector.broadcast %113 : vector<1x256xf32> to vector<8x256xf32>
    %115 = arith.addf %110, %114 : vector<8x256xf32>
    %cst_36 = arith.constant 0.000000e+00 : f32
    %116 = vector.broadcast %cst_36 : f32 to vector<8x256xf32>
    %117 = arith.maximumf %115, %116 : vector<8x256xf32>
    %118 = arith.truncf %117 : vector<8x256xf32> to vector<8x256xbf16>
    %c0_37 = arith.constant 0 : index
    %c0_38 = arith.constant 0 : index
    %119 = vector.load %arg9[%c0_37, %c0_38] : memref<256x64xbf16, #tpu.memory_space<vmem>>, vector<256x64xbf16>
    %cst_39 = arith.constant dense<0.000000e+00> : vector<8x64xf32>
    %120 = tpu.matmul %118, %119, %cst_39 {dimension_numbers = #tpu.dot_dimension_numbers<[1], [0], [0], [1], [0, 0, 1, 1], [], []>} : vector<8x256xbf16>, vector<256x64xbf16>, vector<8x64xf32> -> vector<8x64xf32>
    %c0_40 = arith.constant 0 : index
    %c0_41 = arith.constant 0 : index
    %121 = vector.load %arg10[%c0_40, %c0_41] : memref<1x64xf32, #tpu.memory_space<vmem>>, vector<1x64xf32>
    %122 = vector.shape_cast %121 : vector<1x64xf32> to vector<64xf32>
    %123 = vector.shape_cast %122 : vector<64xf32> to vector<1x64xf32>
    %124 = vector.broadcast %123 : vector<1x64xf32> to vector<8x64xf32>
    %125 = arith.addf %120, %124 : vector<8x64xf32>
    %126 = arith.addf %79, %125 : vector<8x64xf32>
    %c0_42 = arith.constant 0 : index
    %c0_43 = arith.constant 0 : index
    %127 = vector.load %arg13[%c0_42, %c0_43] : memref<8x64xf32, #tpu.memory_space<vmem>>, vector<8x64xf32>
    tpu.vector_store %arg13[%c0_42, %c0_43], %126 {strides = array<i32>} : memref<8x64xf32, #tpu.memory_space<vmem>>, vector<8x64xf32>,
    return
  }
  func.func @transform_0(%arg0: i32) -> (i32, i32) {
    %c0_i32 = arith.constant 0 : i32
    %c0_i32_0 = arith.constant 0 : i32
    return %arg0, %c0_i32 : i32, i32
  }
  func.func @transform_1(%arg0: i32) -> (i32, i32) {
    %c0_i32 = arith.constant 0 : i32
    %c0_i32_0 = arith.constant 0 : i32
    %c0_i32_1 = arith.constant 0 : i32
    return %c0_i32, %c0_i32_0 : i32, i32
  }
  func.func @transform_2(%arg0: i32) -> (i32, i32) {
    %c0_i32 = arith.constant 0 : i32
    %c0_i32_0 = arith.constant 0 : i32
    %c0_i32_1 = arith.constant 0 : i32
    return %c0_i32, %c0_i32_0 : i32, i32
  }
  func.func @transform_3(%arg0: i32) -> (i32, i32) {
    %c0_i32 = arith.constant 0 : i32
    %c0_i32_0 = arith.constant 0 : i32
    %c0_i32_1 = arith.constant 0 : i32
    return %c0_i32, %c0_i32_0 : i32, i32
  }
  func.func @transform_4(%arg0: i32) -> (i32, i32) {
    %c0_i32 = arith.constant 0 : i32
    %c0_i32_0 = arith.constant 0 : i32
    %c0_i32_1 = arith.constant 0 : i32
    return %c0_i32, %c0_i32_0 : i32, i32
  }
  func.func @transform_5(%arg0: i32) -> (i32, i32) {
    %c0_i32 = arith.constant 0 : i32
    %c0_i32_0 = arith.constant 0 : i32
    %c0_i32_1 = arith.constant 0 : i32
    return %c0_i32, %c0_i32_0 : i32, i32
  }
  func.func @transform_6(%arg0: i32) -> (i32, i32) {
    %c0_i32 = arith.constant 0 : i32
    %c0_i32_0 = arith.constant 0 : i32
    %c0_i32_1 = arith.constant 0 : i32
    return %c0_i32, %c0_i32_0 : i32, i32
  }
  func.func @transform_7(%arg0: i32) -> (i32, i32) {
    %c0_i32 = arith.constant 0 : i32
    %c0_i32_0 = arith.constant 0 : i32
    %c0_i32_1 = arith.constant 0 : i32
    return %c0_i32, %c0_i32_0 : i32, i32
  }
  func.func @transform_8(%arg0: i32) -> (i32, i32) {
    %c0_i32 = arith.constant 0 : i32
    %c0_i32_0 = arith.constant 0 : i32
    %c0_i32_1 = arith.constant 0 : i32
    return %c0_i32, %c0_i32_0 : i32, i32
  }
  func.func @transform_9(%arg0: i32) -> (i32, i32) {
    %c0_i32 = arith.constant 0 : i32
    %c0_i32_0 = arith.constant 0 : i32
    %c0_i32_1 = arith.constant 0 : i32
    return %c0_i32, %c0_i32_0 : i32, i32
  }
  func.func @transform_10(%arg0: i32) -> (i32, i32) {
    %c0_i32 = arith.constant 0 : i32
    %c0_i32_0 = arith.constant 0 : i32
    %c0_i32_1 = arith.constant 0 : i32
    return %c0_i32, %c0_i32_0 : i32, i32
  }
  func.func @transform_11(%arg0: i32) -> (i32, i32) {
    %c0_i32 = arith.constant 0 : i32
    %c0_i32_0 = arith.constant 0 : i32
    %c0_i32_1 = arith.constant 0 : i32
    return %c0_i32, %c0_i32_0 : i32, i32
  }
  func.func @transform_12(%arg0: i32) -> (i32, i32) {
    %c0_i32 = arith.constant 0 : i32
    %c0_i32_0 = arith.constant 0 : i32
    return %arg0, %c0_i32 : i32, i32
  }
}

</mosaic_0001>

<bundles_post_ra>
// kernel: tpu_custom_call.1
= control target key start
LH: loop header
LB: loop body
LE: loop exit
PB: predicated region body
PF: predicated region fallthrough
CT: control target
= control target key end

     0   :  { %s4257_s0 = inlined_call_operand.vmem [shape: f32[16,64], index: 0, kind: input, shape index: {}]   ;;  %s4258_s1 = inlined_call_operand.vmem [shape: f32[1,64], index: 1, kind: input, shape index: {}]   ;;  %s4259_s2 = inlined_call_operand.vmem [shape: f32[1,64], index: 2, kind: input, shape index: {}]   ;;  %s4260_s3 = inlined_call_operand.vmem [shape: bf16[64,192], index: 3, kind: input, shape index: {}]   ;;  %s4261_s4 = inlined_call_operand.vmem [shape: bf16[64,64], index: 4, kind: input, shape index: {}]   ;;  %s4262_s5 = inlined_call_operand.vmem [shape: f32[1,64], index: 5, kind: input, shape index: {}]   ;;  %s4263_s6 = inlined_call_operand.vmem [shape: bf16[64,256], index: 6, kind: input, shape index: {}]   ;;  %s4264_s7 = inlined_call_operand.vmem [shape: f32[1,256], index: 7, kind: input, shape index: {}]   ;;  %s4265_s8 = inlined_call_operand.vmem [shape: bf16[256,64], index: 8, kind: input, shape index: {}]   ;;  %s4266_s9 = inlined_call_operand.vmem [shape: f32[1,64], index: 9, kind: input, shape index: {}]   ;;  %s4267_s10 = inlined_call_operand.vmem [shape: f32[1,64], index: 10, kind: input, shape index: {}]   ;;  %s4268_s11 = inlined_call_operand.vmem [shape: f32[1,64], index: 11, kind: input, shape index: {}]   ;;  %s4269_s12 = inlined_call_operand.hbm [shape: f32[16,64], index: 12, kind: output, shape index: {}]  }
   0x1   :  { %4270 = sst [smem:[#allocation5_spill]] %s4257_s0 }
   0x2   :  { %4271 = sst [smem:[#allocation6_spill]] %s4258_s1 }
   0x3   :  { %17 = vsyncpa [#allocation3], 0 }
   0x4   :  { %19 = vsyncpa [#allocation3 + $0x1], 0  ;;  %s3637_s21 = smov 0   ;;  %s3639_s22 = smov 0  }
   0x5   :  { %s3641_s23 = smov 0   ;;  %s3643_s24 = smov 0  }
   0x6 LB: > { %s3658_s25 = sadd.s32 4294967295, %s3549_s24   ;;  %s3077_s26 = sadd.s32 4294967294, %s3549_s24   ;;  %s3549_s24 = sphi %s3643_s24, %s4281_s24   ;;  %s3545_s23 = sphi %s3641_s23, %s4280_s23   ;;  %s3541_s22 = sphi %s3639_s22, %s4279_s22   ;;  %s3537_s21 = sphi %s3637_s21, %s4278_s21  }
   0x7   : > { %s3662_s27 = sadd.s32 1, %s3549_s24   ;;  %s289_s28 = sadd.s32 1, %s3545_s23 }
   0x8   : > { %s286_s29 = ssub.s32 %s3549_s24, %s3662_s27  ;;  %p299_p0 = scmp.ne.s32.totalorder %s3545_s23, %s3541_s22 }
   0x9   : > { %p287_p1 = scmp.eq.s32.totalorder %s286_s29, 0  ;;  %p300_p2 = scmp.eq.s32.totalorder %s3658_s25, 1 }
   0xa   : > { %p305_p3 = scmp.ne.s32.totalorder %s3541_s22, %s3537_s21  ;;  %p306_p4 = scmp.eq.s32.totalorder %s3077_s26, 1 }
   0xb   : > { %s3673_s30 = scalar_select %p287_p1, %s3545_s23, %s289_s28  }
   0xc   : > { %p3675_p5 = por %p300_p2, %p299_p0  ;;  %p3679_p6 = por %p306_p4, %p305_p3 }
   0xd   : > { %p3080_p7 = scmp.ge.s32.totalorder %s3549_s24, 1  ;;  %p364_p8 = scmp.lt.s32.totalorder %s3549_s24, 3 }
   0xf   : > { %p365_p9 = pnand %p3080_p7, %p364_p8 }
  0x10   : > { %p405_p10 = scmp.lt.s32.totalorder (!%p365_p9), %s3658_s25, 1  ;;  %vm413_vm0 = vcmask (!%p365_p9), 523264   ;;  %s4274_s0 = sld [smem:[#allocation5_spill]] (!%p365_p9)  ;;  %v3406_v7 = vld [vmem:[%s4260_s3 + $0x4] ss:$8 sps:$4 sm:$0xff] (!%p365_p9)   ;;  %v3551_v11 = vmov (!%p365_p9), 0   ;;  %v562_v32 = vlaneseq (!%p365_p9) }
  0x11   : > { %368 = sbr.rel (%p365_p9) target bundleno = 2762 (0xaca), region = 68  ;;  %v3408_v8 = vld [vmem:[%s4260_s3] ss:$8 sps:$4 sm:$0xff] (!%p365_p9)   ;;  %v3409_v9 = vld [vmem:[%s4260_s3 + $0x14] ss:$8 sps:$4 sm:$0xff] (!%p365_p9)   ;;  %494 = vmatprep.subr.bf16.mxu1 (!%p365_p9), %v3406_v7  ;;  %526 = vmatprep.mubr.bf16.mxu1 (!%p365_p9), %v3551_v11  ;;  %s4275_s1 = sld [smem:[#allocation6_spill]] (!%p365_p9) }
  0x12   : > { %495 = vmatpush1.bf16.msra.mxu1 (!%p365_p9), %v3408_v8  ;;  %v3411_v10 = vld [vmem:[%s4260_s3 + $0x10] ss:$8 sps:$4 sm:$0xff] (!%p365_p9)   ;;  %v3412_v12 = vld [vmem:[%s4260_s3 + $0x24] ss:$8 sps:$4 sm:$0xff] (!%p365_p9)   ;;  %v3414_v13 = vld [vmem:[%s4260_s3 + $0x20] ss:$8 sps:$4 sm:$0xff] (!%p365_p9)  }
  0x13   : > { %496 = vmatprep.subr.bf16.mxu1 (!%p365_p9), %v3409_v9  ;;  %v3415_v14 = vld [vmem:[%s4260_s3 + $0x34] ss:$8 sps:$4 sm:$0xff] (!%p365_p9)   ;;  %v3417_v15 = vld [vmem:[%s4260_s3 + $0x30] ss:$8 sps:$4 sm:$0xff] (!%p365_p9)   ;;  %v3084_v22 = vld [vmem:[%s4259_s2] ss:$0 sm:$0xff] (!%p365_p9) }
  0x14   : > { %s3554_s17 = smov (!%p365_p9), 112   ;;  %s3555_s18 = smov (!%p365_p9), 96   ;;  %v3560_v30 = vmov (!%p365_p9), 1983009808   ;;  %v3561_v33 = vmov (!%p365_p9), 1934713408  }
  0x15   : > { %s3556_s20 = smov (!%p365_p9), 88   ;;  %s3557_s26 = smov (!%p365_p9), 80   ;;  %v560_v31 = vunpack.c.l.s4 (!%p365_p9), %v3560_v30  ;;  %v624_v34 = vunpack.c.l.s4 (!%p365_p9), %v3561_v33  ;;  %v3738_v36 = vshrl.u32 (!%p365_p9), %v562_v32, 7  ;;  %vm3563_vm1 = vmmov (!%p365_p9), 0  }
  0x16   : > { %497 = vmatpush1.bf16.msra.mxu1 (!%p365_p9), %v3411_v10  ;;  %s3558_s28 = smov (!%p365_p9), 72   ;;  %s3559_s29 = smov (!%p365_p9), 64   ;;  %vm1448_vm2 = vcmask (!%p365_p9), 64512   ;;  %vm1926_vm3 = vcmask (!%p365_p9), 1043456   ;;  %vm2593_vm5 = vcmask (!%p365_p9), 130048   ;;  %vm2595_vm6 = vcmask (!%p365_p9), 195584  }
  0x17   : > { %498 = vmatprep.subr.bf16.mxu1 (!%p365_p9), %v3412_v12  ;;  %v3083_v20 = vld [vmem:[%s4275_s1] ss:$0 sm:$0xff] (!%p365_p9)  ;;  %v561_v35 = vunpack.c.0.s8 (!%p365_p9), %v560_v31  ;;  %v625_v39 = vunpack.c.0.s8 (!%p365_p9), %v624_v34  ;;  %vm2597_vm7 = vcmask (!%p365_p9), 261120   ;;  %vm2599_vm8 = vcmask (!%p365_p9), 326656  }
  0x18   : > { %s406_s15 = scalar_select %p405_p10, %s3658_s25, 1  ;;  %vm2601_vm9 = vcmask 392192   ;;  %vm2603_vm10 = vcmask 457728  }
  0x19   : > { %v3742_v40 = vsub.s32 %v561_v35, %v3738_v36  ;;  %v3747_v46 = vsub.s32 %v625_v39, %v3738_v36 }
  0x1a   : > { %s3082_s16 = sshll.u32 %s406_s15, 3  ;;  %499 = vmatpush1.bf16.msra.mxu1 %v3414_v13  ;;  %s3552_s15 = smov 104  }
  0x1b   : > { %s3690_s19 = scalar_lea.vmem %s4274_s0, %s3082_s16  ;;  %500 = vmatprep.subr.bf16.mxu1 %v3415_v14  ;;  %s3553_s16 = smov 120  }
  0x1c   : > { %v410_v0 = vld [vmem:[%s3690_s19] sm:$0xff]  ;;  %s3177_s0 = sshll.u32 %s3658_s25, 7  ;;  %s3571_s25 = smov [#allocation2]  }
  0x1d   : > { %v414_v1 = vsel %vm413_vm0, %v410_v0, 0.0 }
  0x1e   : > { %415 = vadd.xlane.f32.xlu0 %v414_v1  ;;  %501 = vmatpush1.bf16.msra.mxu1 %v3417_v15  ;;  %v3562_v1 = vmov 0.0  }
  0x1f   : > { %3239 = vmatprep.subr.bf16.mxu1 %v3562_v1  ;;  %3251 = vmatprep.subr.bf16.mxu0 %v3562_v1 }
  0x20   : > { %3253 = vmatprep.mubr.msk.bf16.mxu0 %vm3563_vm1, %v3562_v1 }
  0xab   : > { %v416_v2 = vpop.xlane.xlu0 %415 }
  0xac   : > { %v418_v3 = vmul.f32 0.015625, %v416_v2 }
  0xae   : > { %v419_v4 = vsub.f32 %v410_v0, %v418_v3 }
  0xb0   : > { %v420_v5 = vmul.f32 %v419_v4, %v419_v4 }
  0xb2   : > { %v421_v6 = vsel %vm413_vm0, %v420_v5, 0.0 }
  0xb3   : > { %422 = vadd.xlane.f32.xlu0 %v421_v6 }
 0x140   : > { %v423_v16 = vpop.xlane.xlu0 %422 }
 0x141   : > { %v424_v17 = vmul.f32 0.015625, %v423_v16 }
 0x143   : > { %v425_v18 = vadd.f32 1e-05, %v424_v17 }
 0x145   : > { %3450 = vrsqrt.f32 %v425_v18 }
 0x14f   : > { %v3451_v19 = vpop.eup %3450 }
 0x150   : > { %v427_v21 = vmul.f32 %v3451_v19, %v419_v4 }
 0x152   : > { %v434_v23 = vmul.f32 %v3083_v20, %v427_v21 }
 0x154   : > { %v441_v24 = vadd.f32 %v3084_v22, %v434_v23 }
 0x156   : > { %v442_v25 = vpack.c.bf16 %v441_v24, %v441_v24 }
 0x158   : > { %3093 = vmatmul.mubr.msk.bf16.vlgmr.msra.gmra.mrb[0].mxu1 %vm413_vm0, %v442_v25 }
 0x159   : > { %3241 = vmatprep.mubr.msk.bf16.mxu1 %vm3563_vm1, %v3562_v1 }
 0x22b   : > { %v528_v26 = vpop.f32.mrb[0].mxu1 }
 0x22c   : > { %542 = vrot.lane.b32.xlu0 %v528_v26, %s3552_s15  ;;  %536 = vrot.lane.b32.xlu1 %v528_v26, %s3553_s16  ;;  %v3729_v27 = vpop.f32.mrb[1].mxu1 }
 0x22d   : > { %v532_v28 = vpop.f32.mrb[2].mxu1 }
 0x22e   : > { %v533_v29 = vpop.f32.mrb[3].mxu1 }
 0x230   : > { %539 = vrot.lane.b32.xlu1 %v528_v26, %s3554_s17 }
 0x234   : > { %545 = vrot.lane.b32.xlu1 %v528_v26, %s3555_s18 }
 0x238   : > { %548 = vrot.lane.b32.xlu1 %v528_v26, %s3556_s20 }
 0x23c   : > { %551 = vrot.lane.b32.xlu1 %v528_v26, %s3557_s26 }
 0x240   : > { %554 = vrot.lane.b32.xlu1 %v528_v26, %s3558_s28 }
 0x244   : > { %837 = vrot.lane.b32.xlu1 %v528_v26, %s3559_s29 }
 0x29e   : > { %v543_v37 = vpop.permute.xlu0 %542  ;;  %v537_v38 = vpop.permute.xlu1 %536 }
 0x29f   : > { %839 = vrot.lane.b32.xlu1 %v537_v38, %s3559_s29  ;;  %v573_v41 = vcombine.low %v537_v38, %v543_v37  ;;  %v574_v42 = vcombine.high %v537_v38, %v543_v37 }
 0x2a1   : > { %v581_v47 = vrot.slane %v573_v41, %v3742_v40  ;;  %v588_v48 = vrot.slane %v574_v42, %v3742_v40 }
 0x2a2   : > { %v540_v43 = vpop.permute.xlu1 %539 }
 0x2a3   : > { %v557_v44 = vcombine.low %v528_v26, %v540_v43  ;;  %v558_v45 = vcombine.high %v528_v26, %v540_v43  ;;  %843 = vrot.lane.b32.xlu1 %v543_v37, %s3559_s29  ;;  %841 = vrot.lane.b32.xlu0 %v540_v43, %s3559_s29 }
 0x2a5   : > { %v565_v49 = vrot.slane %v557_v44, %v3742_v40  ;;  %v572_v50 = vrot.slane %v558_v45, %v3742_v40 }
 0x2a6   : > { %v546_v51 = vpop.permute.xlu1 %545 }
 0x2a7   : > { %v621_v52 = vcombine.low %v565_v49, %v581_v47  ;;  %v622_v53 = vcombine.high %v565_v49, %v581_v47  ;;  %v637_v54 = vcombine.low %v572_v50, %v588_v48  ;;  %v638_v55 = vcombine.high %v572_v50, %v588_v48  ;;  %845 = vrot.lane.b32.xlu0 %v546_v51, %s3559_s29 }
 0x2a9   : > { %v629_v56 = vrot.slane %v621_v52, %v3747_v46  ;;  %v636_v57 = vrot.slane %v622_v53, %v3747_v46  ;;  %v645_v58 = vrot.slane %v637_v54, %v3747_v46  ;;  %v652_v59 = vrot.slane %v638_v55, %v3747_v46 }
 0x2aa   : > { %v549_v60 = vpop.permute.xlu1 %548 }
 0x2ab   : > { %v3094_v61 = vcombine.low %v629_v56, %v636_v57  ;;  %v3096_v62 = vcombine.high %v629_v56, %v636_v57  ;;  %v3098_v63 = vcombine.low %v645_v58, %v652_v59  ;;  %v3100_v0 = vcombine.high %v645_v58, %v652_v59  ;;  %847 = vrot.lane.b32.xlu1 %v549_v60, %s3559_s29 }
 0x2ad   : > { %v701_v2 = vrot.slane %v3094_v61, %v3742_v40  ;;  %v717_v3 = vrot.slane %v3096_v62, %v3742_v40  ;;  %v733_v4 = vrot.slane %v3098_v63, %v3742_v40  ;;  %v749_v5 = vrot.slane %v3100_v0, %v3742_v40 }
 0x2ae   : > { %v552_v6 = vpop.permute.xlu1 %551 }
 0x2af   : > { %v757_v7 = vcombine.low %v701_v2, %v717_v3  ;;  %v789_v8 = vcombine.low %v733_v4, %v749_v5  ;;  %v589_v9 = vcombine.low %v546_v51, %v552_v6  ;;  %v590_v10 = vcombine.high %v546_v51, %v552_v6  ;;  %849 = vrot.lane.b32.xlu0 %v552_v6, %s3559_s29 }
 0x2b0   : > { %v758_v12 = vcombine.high %v701_v2, %v717_v3  ;;  %v790_v13 = vcombine.high %v733_v4, %v749_v5 }
 0x2b1   : > { %v765_v14 = vrot.slane %v757_v7, %v3747_v46  ;;  %v797_v15 = vrot.slane %v789_v8, %v3747_v46  ;;  %v597_v25 = vrot.slane %v589_v9, %v3742_v40  ;;  %v604_v26 = vrot.slane %v590_v10, %v3742_v40 }
 0x2b2   : > { %v555_v16 = vpop.permute.xlu1 %554  ;;  %v772_v17 = vrot.slane %v758_v12, %v3747_v46  ;;  %v804_v18 = vrot.slane %v790_v13, %v3747_v46 }
 0x2b3   : > { %v605_v19 = vcombine.low %v549_v60, %v555_v16  ;;  %v606_v20 = vcombine.high %v549_v60, %v555_v16  ;;  %851 = vrot.lane.b32.xlu1 %v555_v16, %s3559_s29  ;;  %1145 = vrot.lane.b32.xlu0 %v3729_v27, %s3554_s17  ;;  %v3773_v21 = vcombine.low %v765_v14, %v797_v15 }
 0x2b4   : > { %v3779_v22 = vcombine.low %v772_v17, %v804_v18  ;;  %v3781_v23 = vcombine.high %v772_v17, %v804_v18  ;;  %v3783_v24 = vcombine.high %v765_v14, %v797_v15 }
 0x2b5   : > { %v613_v28 = vrot.slane %v605_v19, %v3742_v40  ;;  %v620_v29 = vrot.slane %v606_v20, %v3742_v40 }
 0x2b6   : > { %v838_v62 = vpop.permute.xlu1 %837 }
 0x2b7   : > { %v653_v30 = vcombine.low %v597_v25, %v613_v28  ;;  %v654_v31 = vcombine.high %v597_v25, %v613_v28  ;;  %v669_v33 = vcombine.low %v604_v26, %v620_v29  ;;  %v670_v34 = vcombine.high %v604_v26, %v620_v29  ;;  %1142 = vrot.lane.b32.xlu1 %v3729_v27, %s3553_s16 }
 0x2b9   : > { %v661_v35 = vrot.slane %v653_v30, %v3747_v46  ;;  %v668_v37 = vrot.slane %v654_v31, %v3747_v46  ;;  %v677_v38 = vrot.slane %v669_v33, %v3747_v46  ;;  %v684_v39 = vrot.slane %v670_v34, %v3747_v46 }
 0x2bb   : > { %v3095_v41 = vcombine.low %v661_v35, %v668_v37  ;;  %v3097_v42 = vcombine.high %v661_v35, %v668_v37  ;;  %v3099_v43 = vcombine.low %v677_v38, %v684_v39  ;;  %v3101_v44 = vcombine.high %v677_v38, %v684_v39  ;;  %1148 = vrot.lane.b32.xlu1 %v3729_v27, %s3552_s15 }
 0x2bd   : > { %v708_v45 = vrot.slane %v3095_v41, %v3742_v40  ;;  %v724_v47 = vrot.slane %v3097_v42, %v3742_v40  ;;  %v740_v48 = vrot.slane %v3099_v43, %v3742_v40  ;;  %v756_v49 = vrot.slane %v3101_v44, %v3742_v40 }
 0x2bf   : > { %v773_v50 = vcombine.low %v708_v45, %v724_v47  ;;  %v774_v51 = vcombine.high %v708_v45, %v724_v47  ;;  %v805_v52 = vcombine.low %v740_v48, %v756_v49  ;;  %v806_v53 = vcombine.high %v740_v48, %v756_v49 }
 0x2c1   : > { %v781_v54 = vrot.slane %v773_v50, %v3747_v46  ;;  %v813_v55 = vrot.slane %v805_v52, %v3747_v46  ;;  %v788_v56 = vrot.slane %v774_v51, %v3747_v46  ;;  %v820_v57 = vrot.slane %v806_v53, %v3747_v46 }
 0x2c3   : > { %v3805_v58 = vcombine.low %v781_v54, %v813_v55  ;;  %v3807_v59 = vcombine.high %v781_v54, %v813_v55  ;;  %v3809_v60 = vcombine.low %v788_v56, %v820_v57  ;;  %v3811_v61 = vcombine.high %v788_v56, %v820_v57 }
 0x311   : > { %v840_v63 = vpop.permute.xlu1 %839 }
 0x315   : > { %v842_v0 = vpop.permute.xlu0 %841  ;;  %v844_v2 = vpop.permute.xlu1 %843 }
 0x316   : > { %v861_v3 = vcombine.low %v838_v62, %v842_v0  ;;  %v862_v4 = vcombine.high %v838_v62, %v842_v0  ;;  %v877_v5 = vcombine.low %v840_v63, %v844_v2  ;;  %v878_v6 = vcombine.high %v840_v63, %v844_v2 }
 0x318   : > { %v869_v7 = vrot.slane %v861_v3, %v3742_v40  ;;  %v876_v8 = vrot.slane %v862_v4, %v3742_v40  ;;  %v885_v9 = vrot.slane %v877_v5, %v3742_v40  ;;  %v892_v10 = vrot.slane %v878_v6, %v3742_v40 }
 0x319   : > { %v846_v20 = vpop.permute.xlu0 %845 }
 0x31a   : > { %v925_v12 = vcombine.low %v869_v7, %v885_v9  ;;  %v926_v13 = vcombine.high %v869_v7, %v885_v9  ;;  %v941_v14 = vcombine.low %v876_v8, %v892_v10  ;;  %v942_v15 = vcombine.high %v876_v8, %v892_v10 }
 0x31c   : > { %v933_v16 = vrot.slane %v925_v12, %v3747_v46  ;;  %v940_v17 = vrot.slane %v926_v13, %v3747_v46  ;;  %v949_v18 = vrot.slane %v941_v14, %v3747_v46  ;;  %v956_v19 = vrot.slane %v942_v15, %v3747_v46 }
 0x31d   : > { %v848_v35 = vpop.permute.xlu1 %847  ;;  %v829_v13 = vpack.c.bf16 %v3773_v21, %v3773_v21 }
 0x31e   : > { %v3102_v25 = vcombine.low %v933_v16, %v940_v17  ;;  %v3104_v26 = vcombine.high %v933_v16, %v940_v17  ;;  %v3106_v28 = vcombine.low %v949_v18, %v956_v19  ;;  %v3108_v29 = vcombine.high %v949_v18, %v956_v19 }
 0x320   : > { %v1005_v30 = vrot.slane %v3102_v25, %v3742_v40  ;;  %v1021_v31 = vrot.slane %v3104_v26, %v3742_v40  ;;  %v1037_v33 = vrot.slane %v3106_v28, %v3742_v40  ;;  %v1053_v34 = vrot.slane %v3108_v29, %v3742_v40 }
 0x321   : > { %v850_v37 = vpop.permute.xlu0 %849 }
 0x322   : > { %v1061_v38 = vcombine.low %v1005_v30, %v1021_v31  ;;  %v1093_v39 = vcombine.low %v1037_v33, %v1053_v34  ;;  %v1062_v41 = vcombine.high %v1005_v30, %v1021_v31  ;;  %v1094_v42 = vcombine.high %v1037_v33, %v1053_v34 }
 0x323   : > { %v893_v43 = vcombine.low %v846_v20, %v850_v37  ;;  %v894_v44 = vcombine.high %v846_v20, %v850_v37  ;;  %v831_v20 = vpack.c.bf16 %v3779_v22, %v3779_v22 }
 0x324   : > { %v1069_v45 = vrot.slane %v1061_v38, %v3747_v46  ;;  %v1101_v47 = vrot.slane %v1093_v39, %v3747_v46  ;;  %v1076_v49 = vrot.slane %v1062_v41, %v3747_v46  ;;  %v1108_v50 = vrot.slane %v1094_v42, %v3747_v46 }
 0x325   : > { %v852_v48 = vpop.permute.xlu1 %851  ;;  %v901_v55 = vrot.slane %v893_v43, %v3742_v40  ;;  %v908_v56 = vrot.slane %v894_v44, %v3742_v40  ;;  %v1146_v63 = vpop.permute.xlu0 %1145 }
 0x326   : > { %v909_v51 = vcombine.low %v848_v35, %v852_v48  ;;  %v910_v52 = vcombine.high %v848_v35, %v852_v48  ;;  %v1125_v53 = vcombine.low %v1069_v45, %v1101_v47  ;;  %v1127_v54 = vcombine.low %v1076_v49, %v1108_v50 }
 0x327   : > { %v1126_v4 = vcombine.high %v1069_v45, %v1101_v47  ;;  %v1163_v9 = vcombine.low %v3729_v27, %v1146_v63  ;;  %v1164_v18 = vcombine.high %v3729_v27, %v1146_v63  ;;  %v1128_v34 = vcombine.high %v1076_v49, %v1108_v50 }
 0x328   : > { %v917_v57 = vrot.slane %v909_v51, %v3742_v40  ;;  %v924_v62 = vrot.slane %v910_v52, %v3742_v40  ;;  %v1133_v2 = vpack.c.bf16 %v1125_v53, %v1125_v53  ;;  %v1135_v3 = vpack.c.bf16 %v1127_v54, %v1127_v54 }
 0x329   : > { %v1143_v0 = vpop.permute.xlu1 %1142  ;;  %v1134_v25 = vpack.c.bf16 %v1126_v4, %v1126_v4  ;;  %v1171_v30 = vrot.slane %v1163_v9, %v3742_v40  ;;  %v1178_v39 = vrot.slane %v1164_v18, %v3742_v40  ;;  %v1136_v53 = vpack.c.bf16 %v1128_v34, %v1128_v34 }
 0x32a   : > { %v957_v5 = vcombine.low %v901_v55, %v917_v57  ;;  %v958_v6 = vcombine.high %v901_v55, %v917_v57  ;;  %v973_v7 = vcombine.low %v908_v56, %v924_v62  ;;  %v974_v8 = vcombine.high %v908_v56, %v924_v62 }
 0x32b   : > { %v1453_v10 = vsel %vm1448_vm2, %v1133_v2, 0  ;;  %v1545_v12 = vsel %vm1448_vm2, %v1135_v3, 0  ;;  %v1499_v43 = vsel %vm1448_vm2, %v1134_v25, 0  ;;  %v1591_v18 = vsel %vm1448_vm2, %v1136_v53, 0 }
 0x32c   : > { %v965_v14 = vrot.slane %v957_v5, %v3747_v46  ;;  %v972_v15 = vrot.slane %v958_v6, %v3747_v46  ;;  %v981_v16 = vrot.slane %v973_v7, %v3747_v46  ;;  %v988_v17 = vrot.slane %v974_v8, %v3747_v46  ;;  %3240 = vmatpush3.bf16.xpose.msra.mxu1 %v1453_v10 }
 0x32d   : > { %3252 = vmatpush3.bf16.xpose.msra.mxu0 %v1545_v12  ;;  %v1149_v19 = vpop.permute.xlu1 %1148  ;;  %3245 = vmatprep.subr.bf16.mxu1 %v3562_v1  ;;  %v830_v8 = vpack.c.bf16 %v3783_v24, %v3783_v24 }
 0x32e   : > { %v3103_v21 = vcombine.low %v965_v14, %v972_v15  ;;  %v3105_v26 = vcombine.high %v965_v14, %v972_v15  ;;  %v3107_v28 = vcombine.low %v981_v16, %v988_v17  ;;  %v3109_v29 = vcombine.high %v981_v16, %v988_v17  ;;  %3263 = vmatprep.subr.bf16.mxu0 %v3562_v1 }
 0x32f   : > { %v1179_v31 = vcombine.low %v1143_v0, %v1149_v19  ;;  %v1180_v33 = vcombine.high %v1143_v0, %v1149_v19 }
 0x330   : > { %v1012_v35 = vrot.slane %v3103_v21, %v3742_v40  ;;  %v1028_v37 = vrot.slane %v3105_v26, %v3742_v40  ;;  %v1044_v38 = vrot.slane %v3107_v28, %v3742_v40  ;;  %v1060_v22 = vrot.slane %v3109_v29, %v3742_v40 }
 0x331   : > { %v1187_v41 = vrot.slane %v1179_v31, %v3742_v40  ;;  %v1194_v42 = vrot.slane %v1180_v33, %v3742_v40  ;;  %v833_v33 = vpack.c.bf16 %v3805_v58, %v3805_v58 }
 0x332   : > { %v1077_v44 = vcombine.low %v1012_v35, %v1028_v37  ;;  %v1109_v45 = vcombine.low %v1044_v38, %v1060_v22  ;;  %v1078_v47 = vcombine.high %v1012_v35, %v1028_v37  ;;  %v1110_v48 = vcombine.high %v1044_v38, %v1060_v22 }
 0x333   : > { %v1227_v49 = vcombine.low %v1171_v30, %v1187_v41  ;;  %v1228_v50 = vcombine.high %v1171_v30, %v1187_v41  ;;  %v1243_v51 = vcombine.low %v1178_v39, %v1194_v42  ;;  %v1244_v52 = vcombine.high %v1178_v39, %v1194_v42  ;;  %3242 = vmatmul.mubr.msk.bf16.vlgmr.msra.gmra.mrb[4].mxu1 %vm1448_vm2, %v829_v13 }
 0x334   : > { %3254 = vmatmul.mubr.msk.bf16.vlgmr.msra.gmra.mrb[0].mxu0 %vm1448_vm2, %v831_v20  ;;  %3246 = vmatpush3.bf16.xpose.msra.mxu1 %v1499_v43  ;;  %v1085_v54 = vrot.slane %v1077_v44, %v3747_v46  ;;  %v1117_v55 = vrot.slane %v1109_v45, %v3747_v46  ;;  %v1092_v2 = vrot.slane %v1078_v47, %v3747_v46 }
 0x335   : > { %v1235_v56 = vrot.slane %v1227_v49, %v3747_v46  ;;  %v1242_v57 = vrot.slane %v1228_v50, %v3747_v46  ;;  %v1251_v62 = vrot.slane %v1243_v51, %v3747_v46  ;;  %v1258_v63 = vrot.slane %v1244_v52, %v3747_v46  ;;  %3247 = vmatprep.mubr.msk.bf16.mxu1 %vm3563_vm1, %v3562_v1 }
 0x336   : > { %3257 = vmatprep.subr.bf16.mxu1 %v3562_v1  ;;  %v1129_v0 = vcombine.low %v1085_v54, %v1117_v55  ;;  %3265 = vmatprep.mubr.msk.bf16.mxu0 %vm3563_vm1, %v3562_v1  ;;  %v1124_v3 = vrot.slane %v1110_v48, %v3747_v46  ;;  %v1130_v16 = vcombine.high %v1085_v54, %v1117_v55  ;;  %v1446_v49 = vand.u32 127, %v562_v32 }
 0x337   : > { %v3110_v4 = vcombine.low %v1235_v56, %v1242_v57  ;;  %v3112_v5 = vcombine.high %v1235_v56, %v1242_v57  ;;  %v3114_v6 = vcombine.low %v1251_v62, %v1258_v63  ;;  %v3116_v7 = vcombine.high %v1251_v62, %v1258_v63 }
 0x338   : > { %v1137_v9 = vpack.c.bf16 %v1129_v0, %v1129_v0  ;;  %v1131_v17 = vcombine.low %v1092_v2, %v1124_v3  ;;  %v1138_v31 = vpack.c.bf16 %v1130_v16, %v1130_v16  ;;  %v832_v37 = vpack.c.bf16 %v3781_v23, %v3781_v23 }
 0x339   : > { %v1307_v10 = vrot.slane %v3110_v4, %v3742_v40  ;;  %v1323_v12 = vrot.slane %v3112_v5, %v3742_v40  ;;  %v1339_v13 = vrot.slane %v3114_v6, %v3742_v40  ;;  %v1355_v14 = vrot.slane %v3116_v7, %v3742_v40 }
 0x33a   : > { %v1637_v15 = vsel %vm1448_vm2, %v1137_v9, 0  ;;  %v1139_v26 = vpack.c.bf16 %v1131_v17, %v1131_v17  ;;  %v1683_v39 = vsel %vm1448_vm2, %v1138_v31, 0  ;;  %v1132_v41 = vcombine.high %v1092_v2, %v1124_v3 }
 0x33b   : > { %3248 = vmatmul.mubr.msk.bf16.vlgmr.msra.gmra.mrb[8].mxu1 %vm1448_vm2, %v830_v8  ;;  %3264 = vmatpush3.bf16.xpose.msra.mxu0 %v1637_v15  ;;  %v1363_v19 = vcombine.low %v1307_v10, %v1323_v12  ;;  %v1395_v24 = vcombine.low %v1339_v13, %v1355_v14  ;;  %v1364_v20 = vcombine.high %v1307_v10, %v1323_v12 }
 0x33c   : > { %3258 = vmatpush3.bf16.xpose.msra.mxu1 %v1591_v18  ;;  %3259 = vmatprep.mubr.msk.bf16.mxu1 %vm3563_vm1, %v3562_v1  ;;  %v1396_v25 = vcombine.high %v1339_v13, %v1355_v14  ;;  %v1729_v38 = vsel %vm1448_vm2, %v1139_v26, 0  ;;  %v1140_v58 = vpack.c.bf16 %v1132_v41, %v1132_v41  ;;  %v835_v42 = vpack.c.bf16 %v3809_v60, %v3809_v60 }
 0x33d   : > { %3269 = vmatprep.subr.bf16.mxu1 %v3562_v1  ;;  %3275 = vmatprep.subr.bf16.mxu0 %v3562_v1  ;;  %v1378_v21 = vrot.slane %v1364_v20, %v3747_v46  ;;  %v1371_v28 = vrot.slane %v1363_v19, %v3747_v46  ;;  %v1403_v29 = vrot.slane %v1395_v24, %v3747_v46 }
 0x33e   : > { %v1410_v30 = vrot.slane %v1396_v25, %v3747_v46  ;;  %v834_v43 = vpack.c.bf16 %v3807_v59, %v3807_v59  ;;  %v1775_v45 = vsel %vm1448_vm2, %v1140_v58, 0  ;;  %v836_v60 = vpack.c.bf16 %v3811_v61, %v3811_v61 }
 0x33f   : > { %v1427_v22 = vcombine.low %v1371_v28, %v1403_v29  ;;  %v1428_v47 = vcombine.high %v1371_v28, %v1403_v29  ;;  %vm3929_vm4 = vcmp.le.s32.totalorder %v1446_v49, %v3738_v36 }
 0x340   : > { %v3890_v34 = vcombine.low %v1378_v21, %v1410_v30  ;;  %v3892_v35 = vcombine.high %v1378_v21, %v1410_v30 }
 0x341   : > { %v1435_v23 = vpack.c.bf16 %v1427_v22, %v1427_v22  ;;  %v1436_v59 = vpack.c.bf16 %v1428_v47, %v1428_v47 }
 0x342   : > { %3266 = vmatmul.mubr.msk.bf16.vlgmr.msra.gmra.mrb[4].mxu0 %vm1448_vm2, %v833_v33 }
 0x343   : > { %3260 = vmatmul.mubr.msk.bf16.vlgmr.msra.gmra.mrb[12].mxu1 %vm1448_vm2, %v832_v37  ;;  %3276 = vmatpush3.bf16.xpose.msra.mxu0 %v1729_v38  ;;  %v1928_v44 = vsel %vm1926_vm3, %v1435_v23, 0  ;;  %v1974_v48 = vsel %vm1926_vm3, %v1436_v59, 0 }
 0x344   : > { %3270 = vmatpush3.bf16.xpose.msra.mxu1 %v1683_v39  ;;  %3271 = vmatprep.mubr.msk.bf16.mxu1 %vm3563_vm1, %v3562_v1 }
 0x345   : > { %3277 = vmatprep.mubr.msk.bf16.mxu0 %vm3563_vm1, %v3562_v1  ;;  %3281 = vmatprep.subr.bf16.mxu1 %v3562_v1 }
 0x346   : > { %3287 = vmatprep.subr.bf16.mxu0 %v3562_v1 }
 0x34a   : > { %3278 = vmatmul.mubr.msk.bf16.vlgmr.msra.gmra.mrb[8].mxu0 %vm1448_vm2, %v835_v42 }
 0x34b   : > { %3272 = vmatmul.mubr.msk.bf16.vlgmr.msra.gmra.mrb[16].mxu1 %vm1448_vm2, %v834_v43  ;;  %3288 = vmatpush3.bf16.msra.mxu0 %v1928_v44 }
 0x34c   : > { %3282 = vmatpush3.bf16.xpose.msra.mxu1 %v1775_v45  ;;  %3283 = vmatprep.mubr.msk.bf16.mxu1 %vm3563_vm1, %v3562_v1 }
 0x34d   : > { %3293 = vmatprep.subr.bf16.mxu1 %v3562_v1  ;;  %3289 = vmatprep.mubr.msk.bf16.mxu0 %vm3563_vm1, %v3562_v1 }
 0x34e   : > { %3299 = vmatprep.subr.bf16.mxu0 %v3562_v1 }
 0x353   : > { %3284 = vmatmul.mubr.msk.bf16.vlgmr.msra.gmra.mrb[20].mxu1 %vm1448_vm2, %v836_v60 }
 0x354   : > { %3294 = vmatpush3.bf16.msra.mxu1 %v1974_v48  ;;  %3295 = vmatprep.mubr.msk.bf16.mxu1 %vm3563_vm1, %v3562_v1 }
 0x355   : > { %3305 = vmatprep.subr.bf16.mxu1 %v3562_v1 }
 0x406   : > { %v1489_v51 = vpop.f32.mrb[4].mxu1 }
 0x407   : > { %v1819_v61 = vsel %vm3929_vm4, %v1489_v51, -1e+30  ;;  %v1581_v52 = vpop.f32.mrb[0].mxu0  ;;  %v3243_v53 = vpop.f32.mrb[5].mxu1 }
 0x408   : > { %v3255_v54 = vpop.f32.mrb[1].mxu0  ;;  %v1492_v55 = vpop.f32.mrb[6].mxu1  ;;  %v1827_v56 = vsel %vm1448_vm2, %v1819_v61, -inf  ;;  %v1821_v57 = vsel %vm3929_vm4, %v1581_v52, -1e+30 }
 0x409   : > { %v1584_v62 = vpop.f32.mrb[2].mxu0  ;;  %1828 = vmax.xlane.f32.xlu0 %v1827_v56  ;;  %v3244_v32 = vpop.f32.mrb[7].mxu1  ;;  %v1833_v0 = vsel %vm1448_vm2, %v1821_v57, -inf }
 0x40a   : > { %v3256_v63 = vpop.f32.mrb[3].mxu0 }
 0x40d   : > { %1834 = vmax.xlane.f32.xlu0 %v1833_v0 }
 0x40e   : > { %v1535_v2 = vpop.f32.mrb[8].mxu1 }
 0x40f   : > { %v1820_v3 = vsel %vm3929_vm4, %v1535_v2, -1e+30  ;;  %v3249_v4 = vpop.f32.mrb[9].mxu1 }
 0x410   : > { %v1538_v5 = vpop.f32.mrb[10].mxu1  ;;  %v1830_v6 = vsel %vm1448_vm2, %v1820_v3, -inf }
 0x411   : > { %1831 = vmax.xlane.f32.xlu1 %v1830_v6  ;;  %v3250_v7 = vpop.f32.mrb[11].mxu1 }
 0x415   : > { %v1673_v8 = vpop.f32.mrb[4].mxu0 }
 0x416   : > { %v1627_v9 = vpop.f32.mrb[12].mxu1  ;;  %v1823_v10 = vsel %vm3929_vm4, %v1673_v8, -1e+30  ;;  %v3267_v12 = vpop.f32.mrb[5].mxu0 }
 0x417   : > { %v1822_v13 = vsel %vm3929_vm4, %v1627_v9, -1e+30  ;;  %v3261_v14 = vpop.f32.mrb[13].mxu1  ;;  %v1676_v15 = vpop.f32.mrb[6].mxu0  ;;  %v1839_v16 = vsel %vm1448_vm2, %v1823_v10, -inf }
 0x418   : > { %v1630_v17 = vpop.f32.mrb[14].mxu1  ;;  %v3268_v18 = vpop.f32.mrb[7].mxu0  ;;  %1840 = vmax.xlane.f32.xlu1 %v1839_v16  ;;  %v1836_v19 = vsel %vm1448_vm2, %v1822_v13, -inf }
 0x419   : > { %1837 = vmax.xlane.f32.xlu0 %v1836_v19  ;;  %v3262_v24 = vpop.f32.mrb[15].mxu1 }
 0x41d   : > { %v1765_v20 = vpop.f32.mrb[8].mxu0 }
 0x41e   : > { %v1719_v25 = vpop.f32.mrb[16].mxu1  ;;  %v3950_v21 = vsel %vm3929_vm4, %v1765_v20, -1e+30  ;;  %v3279_v26 = vpop.f32.mrb[9].mxu0 }
 0x41f   : > { %v1824_v28 = vsel %vm3929_vm4, %v1719_v25, -1e+30  ;;  %v3273_v29 = vpop.f32.mrb[17].mxu1  ;;  %v1768_v30 = vpop.f32.mrb[10].mxu0  ;;  %v1845_v31 = vsel %vm1448_vm2, %v3950_v21, -inf }
 0x420   : > { %v1722_v33 = vpop.f32.mrb[18].mxu1  ;;  %v3280_v37 = vpop.f32.mrb[11].mxu0  ;;  %1846 = vmax.xlane.f32.xlu1 %v1845_v31  ;;  %v1842_v38 = vsel %vm1448_vm2, %v1824_v28, -inf }
 0x421   : > { %1843 = vmax.xlane.f32.xlu0 %v1842_v38  ;;  %v3274_v22 = vpop.f32.mrb[19].mxu1  ;;  %v1437_v33 = vpack.c.bf16 %v3890_v34, %v3890_v34  ;;  %v1438_v34 = vpack.c.bf16 %v3892_v35, %v3892_v35 }
 0x426   : > { %v1811_v39 = vpop.f32.mrb[20].mxu1 }
 0x427   : > { %v1826_v41 = vsel %vm3929_vm4, %v1811_v39, -1e+30  ;;  %v3285_v23 = vpop.f32.mrb[21].mxu1  ;;  %v2020_v39 = vsel %vm1926_vm3, %v1437_v33, 0 }
 0x428   : > { %v1814_v58 = vpop.f32.mrb[22].mxu1  ;;  %v1848_v42 = vsel %vm1448_vm2, %v1826_v41, -inf }
 0x429   : > { %1849 = vmax.xlane.f32.xlu0 %v1848_v42  ;;  %v3286_v43 = vpop.f32.mrb[23].mxu1 }
 0x431   : > { %1154 = vrot.lane.b32.xlu1 %v3729_v27, %s3556_s20  ;;  %s3564_s20 = smov 16  }
 0x43f   : > { %1151 = vrot.lane.b32.xlu0 %v3729_v27, %s3555_s18  ;;  %s3567_s18 = smov 40  }
 0x496   : > { %v1829_v44 = vpop.xlane.xlu0 %1828 }
 0x497   : > { %v1851_v45 = vsub.f32 %v1819_v61, %v1829_v44 }
 0x499   : > { %v1859_v47 = vmul.f32 1.442695, %v1851_v45 }
 0x49a   : > { %v1835_v59 = vpop.xlane.xlu0 %1834 }
 0x49b   : > { %3452 = vpow2.f32 %v1859_v47  ;;  %v1853_v60 = vsub.f32 %v1821_v57, %v1835_v59  ;;  %v2066_v59 = vsel %vm1926_vm3, %v1438_v34, 0 }
 0x49d   : > { %v1863_v48 = vmul.f32 1.442695, %v1853_v60 }
 0x49e   : > { %v1832_v49 = vpop.xlane.xlu1 %1831 }
 0x49f   : > { %3454 = vpow2.f32 %v1863_v48  ;;  %v1852_v50 = vsub.f32 %v1820_v3, %v1832_v49 }
 0x4a1   : > { %v1861_v51 = vmul.f32 1.442695, %v1852_v50 }
 0x4a3   : > { %3456 = vpow2.f32 %v1861_v51 }
 0x4a5   : > { %v3453_v52 = vpop.eup %3452  ;;  %v1841_v53 = vpop.xlane.xlu1 %1840 }
 0x4a6   : > { %v1855_v54 = vsub.f32 %v1823_v10, %v1841_v53  ;;  %v1838_v55 = vpop.xlane.xlu0 %1837  ;;  %v1875_v56 = vsel %vm1448_vm2, %v3453_v52, 0.0 }
 0x4a7   : > { %v1854_v62 = vsub.f32 %v1822_v13, %v1838_v55  ;;  %1876 = vadd.xlane.f32.xlu1 %v1875_v56 }
 0x4a8   : > { %v1867_v32 = vmul.f32 1.442695, %v1855_v54 }
 0x4a9   : > { %v3455_v61 = vpop.eup %3454  ;;  %v1865_v63 = vmul.f32 1.442695, %v1854_v62 }
 0x4aa   : > { %3458 = vpow2.f32 %v1867_v32  ;;  %v1881_v57 = vsel %vm1448_vm2, %v3455_v61, 0.0 }
 0x4ab   : > { %1882 = vadd.xlane.f32.xlu1 %v1881_v57  ;;  %3460 = vpow2.f32 %v1865_v63 }
 0x4ad   : > { %v3457_v0 = vpop.eup %3456  ;;  %v1847_v15 = vpop.xlane.xlu1 %1846 }
 0x4ae   : > { %v1844_v2 = vpop.xlane.xlu0 %1843  ;;  %v1878_v3 = vsel %vm1448_vm2, %v3457_v0, 0.0  ;;  %v1857_v17 = vsub.f32 %v3950_v21, %v1847_v15 }
 0x4af   : > { %v1856_v4 = vsub.f32 %v1824_v28, %v1844_v2  ;;  %1879 = vadd.xlane.f32.xlu0 %v1878_v3 }
 0x4b0   : > { %v1871_v18 = vmul.f32 1.442695, %v1857_v17 }
 0x4b1   : > { %v1869_v5 = vmul.f32 1.442695, %v1856_v4  ;;  %v1155_v25 = vpop.permute.xlu1 %1154 }
 0x4b3   : > { %3462 = vpow2.f32 %v1869_v5 }
 0x4b4   : > { %v3967_v6 = vpop.eup %3458 }
 0x4b5   : > { %v1887_v7 = vsel %vm1448_vm2, %v3967_v6, 0.0  ;;  %v3971_v8 = vpop.eup %3460 }
 0x4b6   : > { %1888 = vadd.xlane.f32.xlu0 %v1887_v7  ;;  %v1884_v9 = vsel %vm1448_vm2, %v3971_v8, 0.0  ;;  %v1850_v13 = vpop.xlane.xlu0 %1849 }
 0x4b7   : > { %v1858_v14 = vsub.f32 %v1826_v41, %v1850_v13 }
 0x4b9   : > { %v1873_v16 = vmul.f32 1.442695, %v1858_v14 }
 0x4ba   : > { %1885 = vadd.xlane.f32.xlu0 %v1884_v9  ;;  %v1152_v28 = vpop.permute.xlu0 %1151 }
 0x4bb   : > { %3464 = vpow2.f32 %v1873_v16 }
 0x4bc   : > { %3466 = vpow2.f32 %v1871_v18 }
 0x4bd   : > { %v3975_v10 = vpop.eup %3462 }
 0x4be   : > { %v1890_v12 = vsel %vm1448_vm2, %v3975_v10, 0.0 }
 0x4bf   : > { %1891 = vadd.xlane.f32.xlu1 %v1890_v12 }
 0x4c5   : > { %v3984_v19 = vpop.eup %3464 }
 0x4c6   : > { %v1896_v24 = vsel %vm1448_vm2, %v3984_v19, 0.0  ;;  %v3988_v20 = vpop.eup %3466 }
 0x4d0   : > { %1157 = vrot.lane.b32.xlu1 %v3729_v27, %s3557_s26  ;;  %1160 = vrot.lane.b32.xlu0 %v3729_v27, %s3558_s28  ;;  %v1893_v27 = vsel %vm1448_vm2, %v3988_v20, 0.0  ;;  %s3565_s26 = smov 8   ;;  %s3566_s28 = smov 24  }
 0x4ef   : > { %1897 = vadd.xlane.f32.xlu0 %v1896_v24 }
 0x4f4   : > { %1894 = vadd.xlane.f32.xlu1 %v1893_v27 }
 0x534   : > { %v1877_v26 = vpop.xlane.xlu1 %1876 }
 0x535   : > { %3468 = vrcp.f32 %v1877_v26 }
 0x538   : > { %v1883_v21 = vpop.xlane.xlu1 %1882 }
 0x539   : > { %3470 = vrcp.f32 %v1883_v21 }
 0x53c   : > { %v1880_v29 = vpop.xlane.xlu0 %1879 }
 0x53d   : > { %3472 = vrcp.f32 %v1880_v29 }
 0x53f   : > { %v3469_v30 = vpop.eup %3468 }
 0x540   : > { %v1907_v31 = vmul.f32 %v3469_v30, %v3453_v52 }
 0x542   : > { %v1915_v37 = vpack.c.bf16 %v1907_v31, %v1907_v31 }
 0x543   : > { %v3471_v38 = vpop.eup %3470  ;;  %v1889_v22 = vpop.xlane.xlu0 %1888 }
 0x544   : > { %3290 = vmatmul.mubr.msk.bf16.vlgmr.msra.gmra.mrb[12].mxu0 %vm1448_vm2, %v1915_v37  ;;  %v1909_v41 = vmul.f32 %v3471_v38, %v3455_v61 }
 0x545   : > { %3300 = vmatpush3.bf16.msra.mxu0 %v2020_v39  ;;  %3301 = vmatprep.mubr.msk.bf16.mxu0 %vm3563_vm1, %v3562_v1 }
 0x546   : > { %3311 = vmatprep.subr.bf16.mxu0 %v3562_v1  ;;  %v1917_v43 = vpack.c.bf16 %v1909_v41, %v1909_v41 }
 0x547   : > { %v3473_v23 = vpop.eup %3472  ;;  %v1886_v58 = vpop.xlane.xlu0 %1885 }
 0x548   : > { %v1908_v42 = vmul.f32 %v3473_v23, %v3457_v0  ;;  %3474 = vrcp.f32 %v1886_v58 }
 0x549   : > { %3476 = vrcp.f32 %v1889_v22 }
 0x54a   : > { %v1916_v44 = vpack.c.bf16 %v1908_v42, %v1908_v42 }
 0x54b   : > { %v1161_v45 = vpop.permute.xlu0 %1160 }
 0x54c   : > { %3302 = vmatmul.mubr.msk.bf16.vlgmr.msra.gmra.mrb[16].mxu0 %vm1448_vm2, %v1917_v43  ;;  %v1892_v47 = vpop.xlane.xlu1 %1891  ;;  %3296 = vmatmul.mubr.msk.bf16.vlgmr.msra.gmra.mrb[24].mxu1 %vm1448_vm2, %v1916_v44  ;;  %v1211_v60 = vcombine.low %v1155_v25, %v1161_v45  ;;  %v1212_v35 = vcombine.high %v1155_v25, %v1161_v45 }
 0x54d   : > { %3306 = vmatpush3.bf16.msra.mxu1 %v2066_v59  ;;  %3307 = vmatprep.mubr.msk.bf16.mxu1 %vm3563_vm1, %v3562_v1  ;;  %3478 = vrcp.f32 %v1892_v47 }
 0x54e   : > { %3317 = vmatprep.subr.bf16.mxu1 %v3562_v1  ;;  %3313 = vmatprep.mubr.msk.bf16.mxu0 %vm3563_vm1, %v3562_v1  ;;  %v1219_v52 = vrot.slane %v1211_v60, %v3742_v40  ;;  %v1226_v54 = vrot.slane %v1212_v35, %v3742_v40 }
 0x550   : > { %v1158_v48 = vpop.permute.xlu1 %1157 }
 0x551   : > { %v1195_v49 = vcombine.low %v1152_v28, %v1158_v48  ;;  %v1196_v50 = vcombine.high %v1152_v28, %v1158_v48 }
 0x552   : > { %v3475_v51 = vpop.eup %3474 }
 0x553   : > { %v1910_v53 = vmul.f32 %v3475_v51, %v3971_v8  ;;  %v1203_v55 = vrot.slane %v1195_v49, %v3742_v40  ;;  %v1210_v56 = vrot.slane %v1196_v50, %v3742_v40  ;;  %v3477_v27 = vpop.eup %3476 }
 0x554   : > { %v1911_v38 = vmul.f32 %v3477_v27, %v3967_v6 }
 0x555   : > { %v1259_v62 = vcombine.low %v1203_v55, %v1219_v52  ;;  %v1260_v32 = vcombine.high %v1203_v55, %v1219_v52  ;;  %v1275_v61 = vcombine.low %v1210_v56, %v1226_v54  ;;  %v1276_v63 = vcombine.high %v1210_v56, %v1226_v54 }
 0x556   : > { %v1918_v57 = vpack.c.bf16 %v1910_v53, %v1910_v53  ;;  %v1919_v43 = vpack.c.bf16 %v1911_v38, %v1911_v38 }
 0x557   : > { %v1267_v0 = vrot.slane %v1259_v62, %v3747_v46  ;;  %v1274_v2 = vrot.slane %v1260_v32, %v3747_v46  ;;  %v1283_v3 = vrot.slane %v1275_v61, %v3747_v46  ;;  %v1290_v4 = vrot.slane %v1276_v63, %v3747_v46  ;;  %v3479_v29 = vpop.eup %3478 }
 0x558   : > { %3308 = vmatmul.mubr.msk.bf16.vlgmr.msra.gmra.mrb[28].mxu1 %vm1448_vm2, %v1918_v57  ;;  %v1912_v22 = vmul.f32 %v3479_v29, %v3975_v10 }
 0x559   : > { %v3111_v5 = vcombine.low %v1267_v0, %v1274_v2  ;;  %v3113_v7 = vcombine.high %v1267_v0, %v1274_v2  ;;  %v3115_v8 = vcombine.low %v1283_v3, %v1290_v4  ;;  %v3117_v9 = vcombine.high %v1283_v3, %v1290_v4  ;;  %3319 = vmatprep.mubr.msk.bf16.mxu1 %vm3563_vm1, %v3562_v1 }
 0x55a   : > { %v1920_v44 = vpack.c.bf16 %v1912_v22, %v1912_v22  ;;  %v3419_v22 = vld [vmem:[%s4261_s4 + $0x8] sm:$0xff]  }
 0x55b   : > { %v1314_v12 = vrot.slane %v3111_v5, %v3742_v40  ;;  %v1330_v13 = vrot.slane %v3113_v7, %v3742_v40  ;;  %v1346_v14 = vrot.slane %v3115_v8, %v3742_v40  ;;  %v1362_v15 = vrot.slane %v3117_v9, %v3742_v40 }
 0x55d   : > { %v1379_v16 = vcombine.low %v1314_v12, %v1330_v13  ;;  %v1411_v17 = vcombine.low %v1346_v14, %v1362_v15  ;;  %v1380_v18 = vcombine.high %v1314_v12, %v1330_v13  ;;  %v1412_v24 = vcombine.high %v1346_v14, %v1362_v15 }
 0x55f   : > { %v1387_v25 = vrot.slane %v1379_v16, %v3747_v46  ;;  %v1419_v26 = vrot.slane %v1411_v17, %v3747_v46  ;;  %v1394_v28 = vrot.slane %v1380_v18, %v3747_v46  ;;  %v1426_v21 = vrot.slane %v1412_v24, %v3747_v46 }
 0x561   : > { %v1431_v30 = vcombine.low %v1387_v25, %v1419_v26  ;;  %v1432_v31 = vcombine.high %v1387_v25, %v1419_v26  ;;  %v1433_v33 = vcombine.low %v1394_v28, %v1426_v21  ;;  %v1434_v37 = vcombine.high %v1394_v28, %v1426_v21 }
 0x563   : > { %v1439_v39 = vpack.c.bf16 %v1431_v30, %v1431_v30  ;;  %v1440_v41 = vpack.c.bf16 %v1432_v31, %v1432_v31  ;;  %v1441_v42 = vpack.c.bf16 %v1433_v33, %v1433_v33  ;;  %v1442_v34 = vpack.c.bf16 %v1434_v37, %v1434_v37  ;;  %v3418_v30 = vld [vmem:[%s4261_s4] sm:$0xff]  }
 0x565   : > { %v2112_v23 = vsel %vm1926_vm3, %v1439_v39, 0  ;;  %v2158_v58 = vsel %vm1926_vm3, %v1440_v41, 0  ;;  %v2204_v6 = vsel %vm1926_vm3, %v1441_v42, 0  ;;  %v2250_v10 = vsel %vm1926_vm3, %v1442_v34, 0 }
 0x566   : > { %3312 = vmatpush3.bf16.msra.mxu0 %v2112_v23  ;;  %3318 = vmatpush3.bf16.msra.mxu1 %v2158_v58 }
 0x567   : > { %3323 = vmatprep.subr.bf16.mxu0 %v3562_v1  ;;  %3329 = vmatprep.subr.bf16.mxu1 %v3562_v1 }
 0x569   : > { %3314 = vmatmul.mubr.msk.bf16.vlgmr.msra.gmra.mrb[20].mxu0 %vm1448_vm2, %v1919_v43  ;;  %3320 = vmatmul.mubr.msk.bf16.vlgmr.msra.gmra.mrb[32].mxu1 %vm1448_vm2, %v1920_v44 }
 0x56a   : > { %3324 = vmatpush3.bf16.msra.mxu0 %v2204_v6  ;;  %3330 = vmatpush3.bf16.msra.mxu1 %v2250_v10 }
 0x56b   : > { %3331 = vmatprep.mubr.msk.bf16.mxu1 %vm3563_vm1, %v3562_v1  ;;  %3325 = vmatprep.mubr.msk.bf16.mxu0 %vm3563_vm1, %v3562_v1 }
 0x56c   : > { %3335 = vmatprep.subr.bf16.mxu0 %v3562_v1 }
 0x57c   : > { %v1898_v45 = vpop.xlane.xlu0 %1897 }
 0x57d   : > { %3480 = vrcp.f32 %v1898_v45 }
 0x581   : > { %v1895_v47 = vpop.xlane.xlu1 %1894 }
 0x582   : > { %3482 = vrcp.f32 %v1895_v47 }
 0x587   : > { %v3481_v59 = vpop.eup %3480 }
 0x588   : > { %v1914_v60 = vmul.f32 %v3481_v59, %v3984_v19 }
 0x58a   : > { %v1922_v35 = vpack.c.bf16 %v1914_v60, %v1914_v60 }
 0x58c   : > { %v3483_v48 = vpop.eup %3482  ;;  %3332 = vmatmul.mubr.msk.bf16.vlgmr.msra.gmra.mrb[36].mxu1 %vm1448_vm2, %v1922_v35 }
 0x58d   : > { %v1913_v49 = vmul.f32 %v3483_v48, %v3988_v20  ;;  %2814 = vmatprep.mubr.bf16.mxu1 %v3551_v11 }
 0x58f   : > { %v1921_v50 = vpack.c.bf16 %v1913_v49, %v1913_v49 }
 0x591   : > { %3326 = vmatmul.mubr.msk.bf16.vlgmr.msra.gmra.mrb[24].mxu0 %vm1448_vm2, %v1921_v50 }
 0x592   : > { %3343 = vmatprep.mubr.msk.bf16.mxu0 %vm3563_vm1, %v3562_v1  ;;  %3336 = vmatpush3.bf16.msra.mxu0 %v3418_v30 }
 0x593   : > { %3337 = vmatprep.subr.bf16.mxu0 %v3562_v1 }
 0x596   : > { %3338 = vmatpush3.bf16.msra.mxu0 %v3419_v22 }
 0x597   : > { %3339 = vmatprep.subr.bf16.mxu0 %v3562_v1 }
 0x617   : > { %v1964_v51 = vpop.f32.mrb[12].mxu0 }
 0x618   : > { %v3291_v52 = vpop.f32.mrb[13].mxu0 }
 0x619   : > { %v1967_v53 = vpop.f32.mrb[14].mxu0 }
 0x61a   : > { %v3292_v54 = vpop.f32.mrb[15].mxu0 }
 0x61f   : > { %v2010_v55 = vpop.f32.mrb[24].mxu1  ;;  %v2056_v19 = vpop.f32.mrb[16].mxu0 }
 0x620   : > { %v2292_v56 = vcombine.low %v1964_v51, %v2056_v19  ;;  %v2293_v62 = vcombine.high %v1964_v51, %v2056_v19  ;;  %v3297_v32 = vpop.f32.mrb[25].mxu1  ;;  %v3303_v61 = vpop.f32.mrb[17].mxu0 }
 0x621   : > { %v2013_v63 = vpop.f32.mrb[26].mxu1  ;;  %v2059_v20 = vpop.f32.mrb[18].mxu0 }
 0x622   : > { %v3298_v57 = vpop.f32.mrb[27].mxu1  ;;  %v3304_v11 = vpop.f32.mrb[19].mxu0  ;;  %v2300_v7 = vrot.slane %v2292_v56, %v3742_v40  ;;  %v2307_v8 = vrot.slane %v2293_v62, %v3742_v40 }
 0x62b   : > { %v2102_v0 = vpop.f32.mrb[28].mxu1 }
 0x62c   : > { %v2308_v2 = vcombine.low %v2010_v55, %v2102_v0  ;;  %v2309_v3 = vcombine.high %v2010_v55, %v2102_v0  ;;  %v3309_v4 = vpop.f32.mrb[29].mxu1 }
 0x62d   : > { %v2105_v5 = vpop.f32.mrb[30].mxu1 }
 0x62e   : > { %v2316_v9 = vrot.slane %v2308_v2, %v3742_v40  ;;  %v2323_v12 = vrot.slane %v2309_v3, %v3742_v40  ;;  %v3310_v13 = vpop.f32.mrb[31].mxu1 }
 0x630   : > { %v2356_v14 = vcombine.low %v2300_v7, %v2316_v9  ;;  %v2357_v15 = vcombine.high %v2300_v7, %v2316_v9  ;;  %v2372_v16 = vcombine.low %v2307_v8, %v2323_v12  ;;  %v2373_v17 = vcombine.high %v2307_v8, %v2323_v12  ;;  %v3420_v12 = vld [vmem:[%s4261_s4 + $0x10] sm:$0xff]  }
 0x631   : > { %3340 = vmatpush3.bf16.msra.mxu0 %v3420_v12  ;;  %v3434_v12 = vld [vmem:[%s4265_s8 + $0x40] sm:$0xff]  }
 0x632   : > { %v2364_v18 = vrot.slane %v2356_v14, %v3747_v46  ;;  %v2371_v24 = vrot.slane %v2357_v15, %v3747_v46  ;;  %v2380_v27 = vrot.slane %v2372_v16, %v3747_v46  ;;  %v2387_v25 = vrot.slane %v2373_v17, %v3747_v46  ;;  %3341 = vmatprep.subr.bf16.mxu0 %v3562_v1 }
 0x634   : > { %v3134_v26 = vcombine.low %v2364_v18, %v2371_v24  ;;  %v3136_v28 = vcombine.high %v2364_v18, %v2371_v24  ;;  %v3138_v21 = vcombine.low %v2380_v27, %v2387_v25  ;;  %v3140_v29 = vcombine.high %v2380_v27, %v2387_v25  ;;  %v3421_v25 = vld [vmem:[%s4261_s4 + $0x18] sm:$0xff]  }
 0x635   : > { %3342 = vmatpush3.bf16.msra.mxu0 %v3421_v25  ;;  %v3443_v25 = vld [vmem:[%s4265_s8 + $0x20] sm:$0xff]  }
 0x636   : > { %v2436_v31 = vrot.slane %v3134_v26, %v3742_v40  ;;  %v2452_v33 = vrot.slane %v3136_v28, %v3742_v40  ;;  %v2468_v37 = vrot.slane %v3138_v21, %v3742_v40  ;;  %v2484_v38 = vrot.slane %v3140_v29, %v3742_v40  ;;  %3217 = vmatprep.subr.bf16.mxu0 %v3434_v12 }
 0x638   : > { %v2493_v39 = vcombine.high %v2436_v31, %v2452_v33  ;;  %v2525_v41 = vcombine.high %v2468_v37, %v2484_v38  ;;  %v2492_v23 = vcombine.low %v2436_v31, %v2452_v33  ;;  %v2524_v58 = vcombine.low %v2468_v37, %v2484_v38 }
 0x63a   : > { %v2507_v42 = vrot.slane %v2493_v39, %v3747_v46  ;;  %v2539_v34 = vrot.slane %v2525_v41, %v3747_v46  ;;  %v4073_v43 = vrot.slane %v2492_v23, %v3747_v46  ;;  %v4076_v44 = vrot.slane %v2524_v58, %v3747_v46 }
 0x63c   : > { %v2148_v6 = vpop.f32.mrb[20].mxu0  ;;  %v2194_v10 = vpop.f32.mrb[32].mxu1  ;;  %v2558_v45 = vcombine.low %v2507_v42, %v2539_v34  ;;  %v2557_v47 = vcombine.high %v4073_v43, %v4076_v44  ;;  %v2559_v59 = vcombine.high %v2507_v42, %v2539_v34  ;;  %v2556_v60 = vcombine.low %v4073_v43, %v4076_v44 }
 0x63d   : > { %v3315_v35 = vpop.f32.mrb[21].mxu0  ;;  %v3321_v48 = vpop.f32.mrb[33].mxu1 }
 0x63e   : > { %v2151_v49 = vpop.f32.mrb[22].mxu0  ;;  %2569 = vrot.lane.b32.xlu1 %v2558_v45, %s3564_s20  ;;  %2565 = vrot.lane.b32.xlu0 %v2557_v47, %s3565_s26  ;;  %v2197_v50 = vpop.f32.mrb[34].mxu1  ;;  %s3568_s20 = smov 32   ;;  %s3569_s26 = smov 56  }
 0x63f   : > { %v3316_v51 = vpop.f32.mrb[23].mxu0  ;;  %v3322_v52 = vpop.f32.mrb[35].mxu1 }
 0x642   : > { %2573 = vrot.lane.b32.xlu1 %v2559_v59, %s3566_s28  ;;  %s3570_s28 = smov 48  }
 0x65f   : > { %v2286_v53 = vpop.f32.mrb[36].mxu1 }
 0x660   : > { %v2340_v54 = vcombine.low %v2194_v10, %v2286_v53  ;;  %v2341_v55 = vcombine.high %v2194_v10, %v2286_v53  ;;  %v3333_v19 = vpop.f32.mrb[37].mxu1 }
 0x661   : > { %v2289_v56 = vpop.f32.mrb[38].mxu1  ;;  %v3486_v19 = vld [vmem:[%s3690_s19] sm:$0xff] }
 0x662   : > { %v3334_v62 = vpop.f32.mrb[39].mxu1  ;;  %v2348_v11 = vrot.slane %v2340_v54, %v3742_v40  ;;  %v2355_v0 = vrot.slane %v2341_v55, %v3742_v40 }
 0x664   : > { %v2240_v32 = vpop.f32.mrb[24].mxu0 }
 0x665   : > { %v2324_v61 = vcombine.low %v2148_v6, %v2240_v32  ;;  %v2325_v63 = vcombine.high %v2148_v6, %v2240_v32  ;;  %v3327_v20 = vpop.f32.mrb[25].mxu0 }
 0x666   : > { %v2243_v57 = vpop.f32.mrb[26].mxu0 }
 0x667   : > { %v2332_v2 = vrot.slane %v2324_v61, %v3742_v40  ;;  %v2339_v3 = vrot.slane %v2325_v63, %v3742_v40  ;;  %v3328_v4 = vpop.f32.mrb[27].mxu0 }
 0x668   : > { %v3425_v4 = vld [vmem:[%s4263_s6 + $0x10] ss:$8 sps:$4 sm:$0xff]  }
 0x669   : > { %v2388_v5 = vcombine.low %v2332_v2, %v2348_v11  ;;  %v2389_v7 = vcombine.high %v2332_v2, %v2348_v11  ;;  %v2404_v8 = vcombine.low %v2339_v3, %v2355_v0  ;;  %v2405_v9 = vcombine.high %v2339_v3, %v2355_v0  ;;  %v3424_v0 = vld [vmem:[%s4263_s6 + $0x4] ss:$8 sps:$4 sm:$0xff]   ;;  %v3422_v2 = vld [vmem:[%s4263_s6] ss:$8 sps:$4 sm:$0xff]   ;;  %v3427_v3 = vld [vmem:[%s4263_s6 + $0x14] ss:$8 sps:$4 sm:$0xff]  }
 0x66a   : > { %2782 = vmatprep.subr.bf16.mxu1 %v3424_v0 }
 0x66b   : > { %v2396_v13 = vrot.slane %v2388_v5, %v3747_v46  ;;  %v2403_v14 = vrot.slane %v2389_v7, %v3747_v46  ;;  %v2412_v15 = vrot.slane %v2404_v8, %v3747_v46  ;;  %v2419_v16 = vrot.slane %v2405_v9, %v3747_v46  ;;  %2783 = vmatpush1.bf16.msra.mxu1 %v3422_v2  ;;  %v3430_v5 = vld [vmem:[%s4263_s6 + $0x24] ss:$8 sps:$4 sm:$0xff]   ;;  %v3428_v7 = vld [vmem:[%s4263_s6 + $0x20] ss:$8 sps:$4 sm:$0xff]   ;;  %v3431_v8 = vld [vmem:[%s4263_s6 + $0x30] ss:$8 sps:$4 sm:$0xff]  }
 0x66c   : > { %2784 = vmatprep.subr.bf16.mxu1 %v3427_v3  ;;  %v3433_v9 = vld [vmem:[%s4263_s6 + $0x34] ss:$8 sps:$4 sm:$0xff]  }
 0x66d   : > { %v3135_v17 = vcombine.low %v2396_v13, %v2403_v14  ;;  %v3137_v18 = vcombine.high %v2396_v13, %v2403_v14  ;;  %v3139_v24 = vcombine.low %v2412_v15, %v2419_v16  ;;  %v3141_v27 = vcombine.high %v2412_v15, %v2419_v16  ;;  %v3435_v13 = vld [vmem:[%s4265_s8] sm:$0xff]   ;;  %v3436_v14 = vld [vmem:[%s4265_s8 + $0x48] sm:$0xff]   ;;  %v3438_v16 = vld [vmem:[%s4265_s8 + $0x50] sm:$0xff]  }
 0x66e   : > { %v3437_v15 = vld [vmem:[%s4265_s8 + $0x8] sm:$0xff]  }
 0x66f   : > { %v2443_v26 = vrot.slane %v3135_v17, %v3742_v40  ;;  %v2459_v28 = vrot.slane %v3137_v18, %v3742_v40  ;;  %v2475_v21 = vrot.slane %v3139_v24, %v3742_v40  ;;  %v2491_v29 = vrot.slane %v3141_v27, %v3742_v40  ;;  %2785 = vmatpush1.bf16.msra.mxu1 %v3425_v4  ;;  %v3439_v17 = vld [vmem:[%s4265_s8 + $0x10] sm:$0xff]   ;;  %v3440_v18 = vld [vmem:[%s4265_s8 + $0x58] sm:$0xff]   ;;  %v3442_v27 = vld [vmem:[%s4265_s8 + $0x60] sm:$0xff]  }
 0x670   : > { %2786 = vmatprep.subr.bf16.mxu1 %v3430_v5  ;;  %v3441_v24 = vld [vmem:[%s4265_s8 + $0x18] sm:$0xff]  }
 0x671   : > { %v2508_v30 = vcombine.low %v2443_v26, %v2459_v28  ;;  %v2540_v31 = vcombine.low %v2475_v21, %v2491_v29  ;;  %v2509_v33 = vcombine.high %v2443_v26, %v2459_v28  ;;  %v2541_v37 = vcombine.high %v2475_v21, %v2491_v29  ;;  %v3444_v26 = vld [vmem:[%s4265_s8 + $0x68] sm:$0xff]  }
 0x672   : > { %v3445_v28 = vld [vmem:[%s4265_s8 + $0x28] sm:$0xff]  }
 0x673   : > { %v2516_v38 = vrot.slane %v2508_v30, %v3747_v46  ;;  %v2548_v1 = vrot.slane %v2540_v31, %v3747_v46  ;;  %v2523_v22 = vrot.slane %v2509_v33, %v3747_v46  ;;  %v2555_v39 = vrot.slane %v2541_v37, %v3747_v46  ;;  %2787 = vmatpush1.bf16.msra.mxu1 %v3428_v7  ;;  %v3148_v33 = vld [vmem:[%s4267_s10] ss:$0 sm:$0xff] }
 0x674   : > { %2788 = vmatprep.subr.bf16.mxu1 %v3433_v9 }
 0x675   : > { %v2561_v41 = vcombine.high %v2516_v38, %v2548_v1  ;;  %v2560_v23 = vcombine.low %v2516_v38, %v2548_v1  ;;  %v2563_v58 = vcombine.high %v2523_v22, %v2555_v39  ;;  %v2562_v42 = vcombine.low %v2523_v22, %v2555_v39  ;;  %v3149_v38 = vld [vmem:[%s4268_s11] ss:$0 sm:$0xff] }
 0x677   : > { %2581 = vrot.lane.b32.xlu1 %v2561_v41, %s3567_s18  ;;  %2577 = vrot.lane.b32.xlu0 %v2560_v23, %s3568_s20  ;;  %v3446_v41 = vld [vmem:[%s4265_s8 + $0x70] sm:$0xff]   ;;  %s402_s20 = sand.u32 1, %s3541_s22   ;;  %s4214_s18 = scalar_lea.hbm %s4269_s12, %s3177_s0 }
 0x678   : > { %2789 = vmatpush1.bf16.msra.mxu1 %v3431_v8  ;;  %v3447_v23 = vld [vmem:[%s4265_s8 + $0x30] sm:$0xff]  }
 0x67b   : > { %2589 = vrot.lane.b32.xlu1 %v2563_v58, %s3569_s26  ;;  %2585 = vrot.lane.b32.xlu0 %v2562_v42, %s3570_s28  ;;  %v3448_v58 = vld [vmem:[%s4265_s8 + $0x78] sm:$0xff]   ;;  %s3081_s26 = sshll.u32 %s402_s20, 3  ;;  %s3005_s28 = scalar_lea.sflag [#allocation3], %s402_s20 }
 0x67c   : > { %v3449_v42 = vld [vmem:[%s4265_s8 + $0x38] sm:$0xff]   ;;  %s404_s15 = scalar_lea.vmem [#allocation2], %s3081_s26  ;;  %s3491_s26 = sshll.u32 %s3571_s25, 4  ;;  %s3492_s26 = int_to_ptr.vmem [resolvable:$false] %s3491_s26 }
 0x67d   : > { %s3018_s16 = sshll.u32 %s404_s15, 4  ;;  %s3493_s1 = scalar_lea.vmem %s3492_s26, 256  ;;  %s4216_s16 = int_to_ptr.vmem [resolvable:$true] %s3018_s16 }
 0x67e   : > { %s3487_s29 = scalar_lea.vmem %s4216_s16, 128  ;;  %p3494_p0 = scmp.lt.s32.totalorder %s4216_s16, %s3492_s26 }
 0x67f   : > { %p3488_p11 = scmp.ne.s32.totalorder %s4216_s16, %s3487_s29  ;;  %p3495_p1 = scmp.lt.s32.totalorder %s3493_s1, %s3487_s29 }
 0x681   : > { %p3489_p12 = pnand %p3488_p11, %p3675_p5  ;;  %p3496_p2 = por %p3495_p1, %p3494_p0 }
 0x683   : > { %p3490_p13 = pneg %p3489_p12 }
 0x685   : > { %p3497_p3 = pnand %p3496_p2, %p3490_p13 }
 0x6b0   : > { %v2570_v40 = vpop.permute.xlu1 %2569  ;;  %v2566_v34 = vpop.permute.xlu0 %2565 }
 0x6b1   : > { %v2592_v6 = vsel %vm1448_vm2, %v2556_v60, %v2566_v34  ;;  %v3142_v60 = vld [vmem:[%s4262_s5] ss:$0 sm:$0xff] }
 0x6b2   : > { %v2594_v10 = vsel %vm2593_vm5, %v2592_v6, %v2570_v40  ;;  %v2731_v40 = vsub.s32 0, %v3738_v36  ;;  %v2727_v34 = vld [vmem:[%s4264_s7] sm:$0x3]  ;;  %v2735_v6 = vsub.s32 1, %v3738_v36 }
 0x6b3   : > { %v3159_v36 = vld [vmem:[%s4266_s9] ss:$0 sm:$0xff] }
 0x6b4   : > { %v2574_v46 = vpop.permute.xlu1 %2573 }
 0x6b5   : > { %v2596_v45 = vsel %vm2595_vm6, %v2594_v10, %v2574_v46  ;;  %v2732_v46 = vrot.slane %v2727_v34, %v2731_v40  ;;  %v2736_v10 = vrot.slane %v2727_v34, %v2735_v6 }
 0x6e9   : > { %v2582_v47 = vpop.permute.xlu1 %2581  ;;  %v2578_v59 = vpop.permute.xlu0 %2577 }
 0x6ea   : > { %v2598_v35 = vsel %vm2597_vm7, %v2596_v45, %v2578_v59 }
 0x6eb   : > { %v2600_v49 = vsel %vm2599_vm8, %v2598_v35, %v2582_v47 }
 0x6ed   : > { %v2590_v48 = vpop.permute.xlu1 %2589  ;;  %v2586_v50 = vpop.permute.xlu0 %2585 }
 0x6ee   : > { %v2602_v51 = vsel %vm2601_vm9, %v2600_v49, %v2586_v50 }
 0x6ef   : > { %v2604_v43 = vsel %vm2603_vm10, %v2602_v51, %v2590_v48 }
 0x6f0   : > { %v2605_v44 = vpack.c.bf16 %v2604_v43, %v2604_v43 }
 0x6f2   : > { %3344 = vmatmul.mubr.msk.bf16.vlgmr.msra.gmra.mrb[28].mxu0 %vm413_vm0, %v2605_v44 }
 0x6f3   : > { %3218 = vmatpush3.bf16.msra.mxu0 %v3435_v13 }
 0x6f4   : > { %3219 = vmatprep.subr.bf16.mxu0 %v3436_v14 }
 0x6f7   : > { %3220 = vmatpush3.bf16.msra.mxu0 %v3437_v15 }
 0x6f8   : > { %3221 = vmatprep.subr.bf16.mxu0 %v3438_v16 }
 0x6fb   : > { %3222 = vmatpush3.bf16.msra.mxu0 %v3439_v17 }
 0x6fc   : > { %3223 = vmatprep.subr.bf16.mxu0 %v3440_v18 }
 0x6ff   : > { %3224 = vmatpush3.bf16.msra.mxu0 %v3441_v24 }
 0x700   : > { %3225 = vmatprep.subr.bf16.mxu0 %v3442_v27 }
 0x703   : > { %3226 = vmatpush3.bf16.msra.mxu0 %v3443_v25 }
 0x704   : > { %3227 = vmatprep.subr.bf16.mxu0 %v3444_v26 }
 0x707   : > { %3228 = vmatpush3.bf16.msra.mxu0 %v3445_v28 }
 0x708   : > { %3229 = vmatprep.subr.bf16.mxu0 %v3446_v41 }
 0x70b   : > { %3230 = vmatpush3.bf16.msra.mxu0 %v3447_v23 }
 0x70c   : > { %3231 = vmatprep.subr.bf16.mxu0 %v3448_v58 }
 0x70f   : > { %3232 = vmatpush3.bf16.msra.mxu0 %v3449_v42 }
 0x7c5   : > { %v2682_v52 = vpop.f32.mrb[28].mxu0 }
 0x7c6   : > { %v2683_v53 = vadd.f32 %v3142_v60, %v2682_v52  ;;  %v3345_v54 = vpop.f32.mrb[29].mxu0 }
 0x7c7   : > { %v2685_v55 = vpop.f32.mrb[30].mxu0 }
 0x7c8   : > { %v4115_v56 = vadd.f32 %v3486_v19, %v2683_v53  ;;  %v3346_v62 = vpop.f32.mrb[31].mxu0 }
 0x7ca   : > { %v2691_v32 = vsel %vm413_vm0, %v4115_v56, 0.0 }
 0x7cb   : > { %2692 = vadd.xlane.f32.xlu0 %v2691_v32 }
 0x858   : > { %v2693_v61 = vpop.xlane.xlu0 %2692 }
 0x859   : > { %v2694_v63 = vmul.f32 0.015625, %v2693_v61 }
 0x85b   : > { %v2695_v20 = vsub.f32 %v4115_v56, %v2694_v63 }
 0x85d   : > { %v2696_v57 = vmul.f32 %v2695_v20, %v2695_v20 }
 0x85f   : > { %v2697_v11 = vsel %vm413_vm0, %v2696_v57, 0.0 }
 0x860   : > { %2698 = vadd.xlane.f32.xlu1 %v2697_v11 }
 0x8ed   : > { %v2699_v21 = vpop.xlane.xlu1 %2698 }
 0x8ee   : > { %v2700_v29 = vmul.f32 0.015625, %v2699_v21 }
 0x8f0   : > { %v2701_v30 = vadd.f32 1e-05, %v2700_v29 }
 0x8f2   : > { %3484 = vrsqrt.f32 %v2701_v30 }
 0x8fc   : > { %v3485_v31 = vpop.eup %3484 }
 0x8fd   : > { %v2703_v37 = vmul.f32 %v3485_v31, %v2695_v20 }
 0x8ff   : > { %v2710_v1 = vmul.f32 %v3148_v33, %v2703_v37 }
 0x901   : > { %v2717_v22 = vadd.f32 %v3149_v38, %v2710_v1 }
 0x903   : > { %v2718_v39 = vpack.c.bf16 %v2717_v22, %v2717_v22 }
 0x905   : > { %3158 = vmatmul.mubr.msk.bf16.vlgmr.msra.gmra.mrb[40].mxu1 %vm413_vm0, %v2718_v39 }
 0x9d8   : > { %v2816_v45 = vpop.f32.mrb[40].mxu1 }
 0x9d9   : > { %v2817_v47 = vadd.f32 %v2816_v45, %v2732_v46  ;;  %v2818_v59 = vpop.f32.mrb[41].mxu1 }
 0x9da   : > { %v2819_v35 = vadd.f32 %v2818_v59, %v2736_v10  ;;  %v2820_v48 = vpop.f32.mrb[42].mxu1 }
 0x9db   : > { %v2823_v49 = vmax.f32 %v2817_v47, 0.0  ;;  %v2821_v50 = vpop.f32.mrb[43].mxu1 }
 0x9dc   : > { %v2824_v51 = vmax.f32 %v2819_v35, 0.0 }
 0x9dd   : > { %v2825_v44 = vpack.c.bf16 %v2823_v49, %v2823_v49 }
 0x9de   : > { %v2826_v43 = vpack.c.bf16 %v2824_v51, %v2824_v51 }
 0x9e0   : > { %2994 = vmatprep.mubr.bf16.mxu0 %v2826_v43 }
 0x9e1   : > { %2995 = vmatmul.mubr.bf16.vlgmr.msra.gmra.mrb[32].mxu0 %v2825_v44 }
 0xab4   : > { %v3233_v60 = vpop.f32.mrb[32].mxu0 }
 0xab5   : > { %v3234_v52 = vpop.f32.mrb[33].mxu0 }
 0xab6   : > { %v3235_v53 = vadd.f32 %v3234_v52, %v3233_v60  ;;  %v3236_v54 = vpop.f32.mrb[34].mxu0 }
 0xab7   : > { %v3237_v55 = vpop.f32.mrb[35].mxu0 }
 0xab8   : > { %v2997_v19 = vadd.f32 %v3235_v53, %v3159_v36 }
 0xaba   : > { %v3002_v62 = vadd.f32 %v2997_v19, %v4115_v56 }
 0xabc   : > { %3003 = vst.msk [vmem:[%s404_s15] sm:$0xff] %vm413_vm0, %v3002_v62 }
 0xabd   : > { %3500 = shalt.err (!%p3497_p3)
}
 0xabe   : > { %s3501_s20 = scalar_lea.hbm %s4214_s18, 128  ;;  %s3505_s17 = scalar_lea.hbm %s4269_s12, 256 }
 0xabf   : > { %p3502_p4 = scmp.ne.s32.totalorder %s4214_s18, %s3501_s20  ;;  %p3506_p9 = scmp.lt.u32.totalorder %s4214_s18, %s4269_s12 }
 0xac0   : > { %p3507_p10 = scmp.lt.u32.totalorder %s3505_s17, %s3501_s20  ;;  %p3509_p12 = scmp.lt.u32.totalorder %s3501_s20, %s4214_s18 }
 0xac1   : > { %p3503_p7 = pnand %p3502_p4, %p3675_p5 }
 0xac2   : > { %p3508_p11 = por %p3507_p10, %p3506_p9 }
 0xac3   : > { %p3504_p8 = pneg %p3503_p7 }
 0xac4   : > { %p3510_p13 = por %p3509_p12, %p3508_p11 }
 0xac6   : > { %p3511_p0 = pnand %p3510_p13, %p3504_p8 }
 0xac8   : > { %3514 = shalt.err (!%p3511_p0)
}
 0xac9   : > { %3347 = dma.vmem_to_hbm [thread:$0]  (%p3675_p5), %s4216_s16, 128, %s4214_s18, %s3005_s28  }
 0xaca PF: > { %p3353_p1 = scmp.ge.s32.totalorder %s3549_s24, 2  ;;  %s3030_s1 = sand.u32 1, %s3537_s21  }
 0xacb   : > { %s3031_s29 = scalar_lea.sflag [#allocation3], %s3030_s1 }
 0xacc   : > { %p3350_p2 = pnand %p3353_p1, %p3679_p6 }
 0xace   : > { %3532 = dma.done.wait (!%p3350_p2), %s3031_s29, 128  }
 0xacf   : > { %3534 = vsyncadd (!%p3350_p2), %s3031_s29, 4294967168  ;;  %p22_p3 = scmp.ge.s32.totalorder %s3662_s27, 4   ;;  %s4278_s21 = smov %s3541_s22 }
 0xad0   : > { %s4279_s22 = smov %s3545_s23  ;;  %s4280_s23 = smov %s3673_s30 }
 0xad1   : > { %s4281_s24 = smov %s3662_s27  ;;  %24 = sbr.rel (!%p22_p3) target bundleno = 6 (0x6), region = 103 }
 0xad8   :  { %3036 = vsyncpa [#allocation3], 1 }
 0xad9   :  { %3038 = vsyncpa [#allocation3 + $0x1], 1 }

</bundles_post_ra>
